<compile_context>
chip_gen: v7x
topology: tpu7x:2x2x1
jax: 0.10.0
libtpu: 0.0.40
codegen_flags: <defaults>
</compile_context>

<pallas_src>
import functools

import jax
import jax.numpy as jnp
from jax.experimental import pallas as pl
from jax.experimental.pallas import tpu as pltpu

COMPUTE_DTYPE = jnp.bfloat16   # MXU-native operands; f32 accumulation in-kernel.


# ----------------------------------------------------------------------------
# Static shape helpers (all Python ints at trace time).
# ----------------------------------------------------------------------------
def _cdiv(a, b):
    return -(-a // b)


def _round_up(x, m):
    return _cdiv(x, m) * m


def _row_tiling(M, max_tile=512):
    """Pick (rows per grid step, padded row count).

    * tiny M: a single block equal to the full array (no pad, no pad copy);
    * otherwise: a multiple-of-8 tile giving >=2 grid steps (so the 'parallel'
      axis can shard across v7x's two TensorCores) with minimal padding.
    """
    if M <= 16:
        return M, M
    ntiles = max(2, _cdiv(M, max_tile))
    tm = _round_up(_cdiv(M, ntiles), 8)
    return tm, _round_up(M, tm)


# ----------------------------------------------------------------------------
# Pallas kernels.
# ----------------------------------------------------------------------------
def _matmul_bias_kernel(x_ref, w_ref, b_ref, o_ref, *, relu):
    """o = relu?(x @ w + b) for one row tile; f32 accumulation on the MXU."""
    acc = jnp.dot(x_ref[...], w_ref[...], preferred_element_type=jnp.float32)
    acc = acc + b_ref[...]                       # (1, N) bias broadcasts over rows
    if relu:
        acc = jnp.maximum(acc, 0.0)
    o_ref[...] = acc.astype(o_ref.dtype)


def _mlp_head_kernel(x_ref, w1_ref, b1_ref, w2_ref, b2_ref, o_ref):
    """Fused fc1(ReLU) + fc2: the 256-wide hidden never leaves VMEM."""
    h = jnp.dot(x_ref[...], w1_ref[...], preferred_element_type=jnp.float32)
    h = jnp.maximum(h + b1_ref[...], 0.0)
    out = jnp.dot(h.astype(w2_ref.dtype), w2_ref[...],
                  preferred_element_type=jnp.float32)
    o_ref[...] = (out + b2_ref[...]).astype(o_ref.dtype)


# ----------------------------------------------------------------------------
# Pallas wrappers.
# ----------------------------------------------------------------------------
def matmul_bias_act(x, w, b, *, relu, out_dtype=None, max_tile=512):
    """[M, K] @ [K, N] + b (+ReLU), row-tiled over M, full K / N per step."""
    M, K = x.shape
    K2, N = w.shape
    assert K == K2 and b.shape == (N,)
    out_dtype = x.dtype if out_dtype is None else out_dtype
    tm, Mp = _row_tiling(M, max_tile)
    xp = x if Mp == M else jnp.pad(x, ((0, Mp - M), (0, 0)))
    out = pl.pallas_call(
        functools.partial(_matmul_bias_kernel, relu=relu),
        grid=(Mp // tm,),
        out_shape=jax.ShapeDtypeStruct((Mp, N), out_dtype),
        in_specs=[
            pl.BlockSpec((tm, K), lambda i: (i, 0)),   # activation row tile
            pl.BlockSpec((K, N), lambda i: (0, 0)),    # full weight, VMEM-resident
            pl.BlockSpec((1, N), lambda i: (0, 0)),    # bias row
        ],
        out_specs=pl.BlockSpec((tm, N), lambda i: (i, 0)),
        compiler_params=pltpu.CompilerParams(dimension_semantics=("parallel",)),
    )(xp, w, b.reshape(1, N))
    return out if Mp == M else out[:M]


def mlp_head(x, w1, b1, w2, b2, *, max_tile=256):
    """Fused fc1(ReLU)+fc2: [M, K1] -> [M, N] in a single pallas_call."""
    M, K1 = x.shape
    K1b, H = w1.shape
    H2, N = w2.shape
    assert K1 == K1b and H == H2 and b1.shape == (H,) and b2.shape == (N,)
    tm, Mp = _row_tiling(M, max_tile)
    xp = x if Mp == M else jnp.pad(x, ((0, Mp - M), (0, 0)))
    out = pl.pallas_call(
        _mlp_head_kernel,
        grid=(Mp // tm,),
        out_shape=jax.ShapeDtypeStruct((Mp, N), jnp.float32),
        in_specs=[
            pl.BlockSpec((tm, K1), lambda i: (i, 0)),  # batch-row tile
            pl.BlockSpec((K1, H), lambda i: (0, 0)),   # fc1 weight (constant block)
            pl.BlockSpec((1, H), lambda i: (0, 0)),    # fc1 bias
            pl.BlockSpec((H, N), lambda i: (0, 0)),    # fc2 weight (constant block)
            pl.BlockSpec((1, N), lambda i: (0, 0)),    # fc2 bias
        ],
        out_specs=pl.BlockSpec((tm, N), lambda i: (i, 0)),
        compiler_params=pltpu.CompilerParams(dimension_semantics=("parallel",)),
    )(xp, w1, b1.reshape(1, H), w2, b2.reshape(1, N))
    return out if Mp == M else out[:M]


# ----------------------------------------------------------------------------
# Glue: NHWC im2col (thin XLA glue; see TODO(synk) above).
# ----------------------------------------------------------------------------
def _im2col_nhwc(x, kh, kw, stride):
    """NHWC patch extraction; K ordering = (tap_i, tap_j, channel), c fastest."""
    B, H, W, C = x.shape
    oh = (H - kh) // stride + 1
    ow = (W - kw) // stride + 1
    patches = [
        x[:, i:i + stride * oh:stride, j:j + stride * ow:stride, :]
        for i in range(kh) for j in range(kw)
    ]
    cols = jnp.concatenate(patches, axis=-1)          # [B, oh, ow, kh*kw*C]
    return cols.reshape(B * oh * ow, kh * kw * C), oh, ow


def conv2d_relu_nhwc(x, w_packed, b, *, kh, kw, stride):
    """x: [B,H,W,C] NHWC, w_packed: [kh*kw*C, O] -> ReLU(conv) as NHWC [B,oh,ow,O]."""
    B = x.shape[0]
    O = w_packed.shape[1]
    cols, oh, ow = _im2col_nhwc(x, kh, kw, stride)
    y = matmul_bias_act(cols, w_packed, b, relu=True)  # [B*oh*ow, O] == NHWC rows
    return y.reshape(B, oh, ow, O)


# ----------------------------------------------------------------------------
# Parameters: PyTorch-layout init, then one-time packing for the kernels.
# ----------------------------------------------------------------------------
def init_torch_params(key):
    """Parameters in native PyTorch layouts (Conv2d: [O,C,kh,kw], Linear: [out,in])."""
    ks = jax.random.split(key, 8)

    def u(k, shape, fan_in):
        bound = 1.0 / jnp.sqrt(fan_in)
        return jax.random.uniform(k, shape, jnp.float32, -bound, bound)

    return {
        "conv1_w": u(ks[0], (16, 4, 8, 8), 4 * 8 * 8),
        "conv1_b": u(ks[1], (16,), 4 * 8 * 8),
        "conv2_w": u(ks[2], (32, 16, 4, 4), 16 * 4 * 4),
        "conv2_b": u(ks[3], (32,), 16 * 4 * 4),
        "fc1_w": u(ks[4], (256, 32 * 81), 32 * 81),
        "fc1_b": u(ks[5], (256,), 32 * 81),
        "fc2_w": u(ks[6], (6, 256), 256),
        "fc2_b": u(ks[7], (6,), 256),
    }


def pack_params(tp, compute_dtype=COMPUTE_DTYPE):
    """One-time repack of PyTorch-layout weights into the layouts the kernels use.

    conv: [O, C, kh, kw] -> [kh*kw*C, O]              (matches _im2col_nhwc K order)
    fc1 : [256, 32*81] (rows = NCHW flatten c*81+y*9+x) -> rows permuted to the
          NHWC flatten (y*9+x)*32+c and transposed to [2592, 256]
    fc2 : [6, 256] -> [256, 6]
    Done outside the jitted forward, so no weight transposes happen per call.
    """
    def pack_conv(w):
        O, C, kh, kw = w.shape
        return jnp.transpose(w, (2, 3, 1, 0)).reshape(kh * kw * C, O).astype(compute_dtype)

    fc1_w = tp["fc1_w"].reshape(256, 32, 9, 9)                         # [N, c, y, x]
    fc1_w = jnp.transpose(fc1_w, (2, 3, 1, 0)).reshape(32 * 81, 256)   # rows = (y, x, c)

    return {
        "conv1_w": pack_conv(tp["conv1_w"]),
        "conv1_b": tp["conv1_b"].astype(jnp.float32),
        "conv2_w": pack_conv(tp["conv2_w"]),
        "conv2_b": tp["conv2_b"].astype(jnp.float32),
        "fc1_w": fc1_w.astype(compute_dtype),
        "fc1_b": tp["fc1_b"].astype(jnp.float32),
        "fc2_w": jnp.transpose(tp["fc2_w"]).astype(compute_dtype),
        "fc2_b": tp["fc2_b"].astype(jnp.float32),
    }


# ----------------------------------------------------------------------------
# Forward pass (matches CNN_2c2f.forward).
# ----------------------------------------------------------------------------
@jax.jit
def cnn_2c2f_forward(params, x):
    """x: [B, 4, 84, 84] NCHW (PyTorch convention) -> [B, 6] logits (f32)."""
    dt = params["conv1_w"].dtype
    x = jnp.transpose(x, (0, 2, 3, 1)).astype(dt)        # single cheap NHWC transpose
    x = conv2d_relu_nhwc(x, params["conv1_w"], params["conv1_b"],
                         kh=8, kw=8, stride=4)           # [B, 20, 20, 16]
    x = conv2d_relu_nhwc(x, params["conv2_w"], params["conv2_b"],
                         kh=4, kw=4, stride=2)           # [B, 9, 9, 32]
    x = x.reshape(x.shape[0], 9 * 9 * 32)                # NHWC flatten (fc1_w rows pre-permuted)
    return mlp_head(x, params["fc1_w"], params["fc1_b"],
                    params["fc2_w"], params["fc2_b"])    # fused fc1(ReLU)+fc2 -> [B, 6]


if __name__ == "__main__":
    key = jax.random.PRNGKey(0)
    pkey, xkey = jax.random.split(key)
    params = pack_params(init_torch_params(pkey))
    # Smallest shape consistent with the module: batch=2, Atari 4x84x84 frames
    # (84 is forced by fc1's 32*81 = 32*9*9 input size).
    x = jax.random.normal(xkey, (2, 4, 84, 84), jnp.float32)
    out = cnn_2c2f_forward(params, x)
    out = jax.block_until_ready(out)
    assert out.shape == (2, 6), out.shape
    assert bool(jnp.all(jnp.isfinite(out)))
    print("KERNEL_OK")
</pallas_src>

<mosaic_0001>
module attributes {stable_mosaic.version = 11 : i64} {
  func.func @_matmul_bias_kernel(%arg0: i32, %arg1: memref<400x256xbf16, #tpu.memory_space<vmem>>, %arg2: memref<256x16xbf16, #tpu.memory_space<vmem>>, %arg3: memref<1x16xf32, #tpu.memory_space<vmem>>, %arg4: memref<400x16xbf16, #tpu.memory_space<vmem>>) attributes {dimension_semantics = [#tpu.dimension_semantics<parallel>], iteration_bounds = array<i64: 2>, scalar_prefetch = 0 : i64, scratch_operands = 0 : i64, tpu.core_type = #tpu.core_type<tc>, window_params = [{transform_indices = @transform_0, window_bounds = array<i64: 400, 256>}, {pipeline_mode = #tpu.pipeline_mode<synchronous>, transform_indices = @transform_1, window_bounds = array<i64: 256, 16>}, {pipeline_mode = #tpu.pipeline_mode<synchronous>, transform_indices = @transform_2, window_bounds = array<i64: 1, 16>}, {transform_indices = @transform_3, window_bounds = array<i64: 400, 16>}]} {
    %c0 = arith.constant 0 : index
    %c0_0 = arith.constant 0 : index
    %0 = vector.load %arg1[%c0, %c0_0] : memref<400x256xbf16, #tpu.memory_space<vmem>>, vector<400x256xbf16>
    %c0_1 = arith.constant 0 : index
    %c0_2 = arith.constant 0 : index
    %1 = vector.load %arg2[%c0_1, %c0_2] : memref<256x16xbf16, #tpu.memory_space<vmem>>, vector<256x16xbf16>
    %cst = arith.constant dense<0.000000e+00> : vector<400x16xf32>
    %2 = tpu.matmul %0, %1, %cst {dimension_numbers = #tpu.dot_dimension_numbers<[1], [0], [0], [1], [0, 0, 1, 1], [], []>} : vector<400x256xbf16>, vector<256x16xbf16>, vector<400x16xf32> -> vector<400x16xf32>
    %c0_3 = arith.constant 0 : index
    %c0_4 = arith.constant 0 : index
    %3 = vector.load %arg3[%c0_3, %c0_4] : memref<1x16xf32, #tpu.memory_space<vmem>>, vector<1x16xf32>
    %4 = vector.broadcast %3 : vector<1x16xf32> to vector<400x16xf32>
    %5 = arith.addf %2, %4 : vector<400x16xf32>
    %cst_5 = arith.constant 0.000000e+00 : f32
    %6 = vector.broadcast %cst_5 : f32 to vector<400x16xf32>
    %7 = arith.maximumf %5, %6 : vector<400x16xf32>
    %8 = arith.truncf %7 : vector<400x16xf32> to vector<400x16xbf16>
    %c0_6 = arith.constant 0 : index
    %c0_7 = arith.constant 0 : index
    %9 = vector.load %arg4[%c0_6, %c0_7] : memref<400x16xbf16, #tpu.memory_space<vmem>>, vector<400x16xbf16>
    tpu.vector_store %arg4[%c0_6, %c0_7], %8 {strides = array<i32>} : memref<400x16xbf16, #tpu.memory_space<vmem>>, vector<400x16xbf16>,
    return
  }
  func.func @transform_0(%arg0: i32) -> (i32, i32) {
    %c0_i32 = arith.constant 0 : i32
    %c0_i32_0 = arith.constant 0 : i32
    return %arg0, %c0_i32 : i32, i32
  }
  func.func @transform_1(%arg0: i32) -> (i32, i32) {
    %c0_i32 = arith.constant 0 : i32
    %c0_i32_0 = arith.constant 0 : i32
    %c0_i32_1 = arith.constant 0 : i32
    return %c0_i32, %c0_i32_0 : i32, i32
  }
  func.func @transform_2(%arg0: i32) -> (i32, i32) {
    %c0_i32 = arith.constant 0 : i32
    %c0_i32_0 = arith.constant 0 : i32
    %c0_i32_1 = arith.constant 0 : i32
    return %c0_i32, %c0_i32_0 : i32, i32
  }
  func.func @transform_3(%arg0: i32) -> (i32, i32) {
    %c0_i32 = arith.constant 0 : i32
    %c0_i32_0 = arith.constant 0 : i32
    return %arg0, %c0_i32 : i32, i32
  }
}

module attributes {stable_mosaic.version = 11 : i64} {
  func.func @_matmul_bias_kernel(%arg0: i32, %arg1: memref<88x256xbf16, #tpu.memory_space<vmem>>, %arg2: memref<256x32xbf16, #tpu.memory_space<vmem>>, %arg3: memref<1x32xf32, #tpu.memory_space<vmem>>, %arg4: memref<88x32xbf16, #tpu.memory_space<vmem>>) attributes {dimension_semantics = [#tpu.dimension_semantics<parallel>], iteration_bounds = array<i64: 2>, scalar_prefetch = 0 : i64, scratch_operands = 0 : i64, tpu.core_type = #tpu.core_type<tc>, window_params = [{transform_indices = @transform_0, window_bounds = array<i64: 88, 256>}, {pipeline_mode = #tpu.pipeline_mode<synchronous>, transform_indices = @transform_1, window_bounds = array<i64: 256, 32>}, {pipeline_mode = #tpu.pipeline_mode<synchronous>, transform_indices = @transform_2, window_bounds = array<i64: 1, 32>}, {transform_indices = @transform_3, window_bounds = array<i64: 88, 32>}]} {
    %c0 = arith.constant 0 : index
    %c0_0 = arith.constant 0 : index
    %0 = vector.load %arg1[%c0, %c0_0] : memref<88x256xbf16, #tpu.memory_space<vmem>>, vector<88x256xbf16>
    %c0_1 = arith.constant 0 : index
    %c0_2 = arith.constant 0 : index
    %1 = vector.load %arg2[%c0_1, %c0_2] : memref<256x32xbf16, #tpu.memory_space<vmem>>, vector<256x32xbf16>
    %cst = arith.constant dense<0.000000e+00> : vector<88x32xf32>
    %2 = tpu.matmul %0, %1, %cst {dimension_numbers = #tpu.dot_dimension_numbers<[1], [0], [0], [1], [0, 0, 1, 1], [], []>} : vector<88x256xbf16>, vector<256x32xbf16>, vector<88x32xf32> -> vector<88x32xf32>
    %c0_3 = arith.constant 0 : index
    %c0_4 = arith.constant 0 : index
    %3 = vector.load %arg3[%c0_3, %c0_4] : memref<1x32xf32, #tpu.memory_space<vmem>>, vector<1x32xf32>
    %4 = vector.broadcast %3 : vector<1x32xf32> to vector<88x32xf32>
    %5 = arith.addf %2, %4 : vector<88x32xf32>
    %cst_5 = arith.constant 0.000000e+00 : f32
    %6 = vector.broadcast %cst_5 : f32 to vector<88x32xf32>
    %7 = arith.maximumf %5, %6 : vector<88x32xf32>
    %8 = arith.truncf %7 : vector<88x32xf32> to vector<88x32xbf16>
    %c0_6 = arith.constant 0 : index
    %c0_7 = arith.constant 0 : index
    %9 = vector.load %arg4[%c0_6, %c0_7] : memref<88x32xbf16, #tpu.memory_space<vmem>>, vector<88x32xbf16>
    tpu.vector_store %arg4[%c0_6, %c0_7], %8 {strides = array<i32>} : memref<88x32xbf16, #tpu.memory_space<vmem>>, vector<88x32xbf16>,
    return
  }
  func.func @transform_0(%arg0: i32) -> (i32, i32) {
    %c0_i32 = arith.constant 0 : i32
    %c0_i32_0 = arith.constant 0 : i32
    return %arg0, %c0_i32 : i32, i32
  }
  func.func @transform_1(%arg0: i32) -> (i32, i32) {
    %c0_i32 = arith.constant 0 : i32
    %c0_i32_0 = arith.constant 0 : i32
    %c0_i32_1 = arith.constant 0 : i32
    return %c0_i32, %c0_i32_0 : i32, i32
  }
  func.func @transform_2(%arg0: i32) -> (i32, i32) {
    %c0_i32 = arith.constant 0 : i32
    %c0_i32_0 = arith.constant 0 : i32
    %c0_i32_1 = arith.constant 0 : i32
    return %c0_i32, %c0_i32_0 : i32, i32
  }
  func.func @transform_3(%arg0: i32) -> (i32, i32) {
    %c0_i32 = arith.constant 0 : i32
    %c0_i32_0 = arith.constant 0 : i32
    return %arg0, %c0_i32 : i32, i32
  }
}

module attributes {stable_mosaic.version = 11 : i64} {
  func.func @_mlp_head_kernel(%arg0: i32, %arg1: memref<2x2592xbf16, #tpu.memory_space<vmem>>, %arg2: memref<2592x256xbf16, #tpu.memory_space<vmem>>, %arg3: memref<1x256xf32, #tpu.memory_space<vmem>>, %arg4: memref<256x6xbf16, #tpu.memory_space<vmem>>, %arg5: memref<1x6xf32, #tpu.memory_space<vmem>>, %arg6: memref<2x6xf32, #tpu.memory_space<vmem>>) attributes {dimension_semantics = [#tpu.dimension_semantics<parallel>], iteration_bounds = array<i64: 1>, scalar_prefetch = 0 : i64, scratch_operands = 0 : i64, tpu.core_type = #tpu.core_type<tc>, window_params = [{transform_indices = @transform_0, window_bounds = array<i64: 2, 2592>}, {pipeline_mode = #tpu.pipeline_mode<synchronous>, transform_indices = @transform_1, window_bounds = array<i64: 2592, 256>}, {pipeline_mode = #tpu.pipeline_mode<synchronous>, transform_indices = @transform_2, window_bounds = array<i64: 1, 256>}, {pipeline_mode = #tpu.pipeline_mode<synchronous>, transform_indices = @transform_3, window_bounds = array<i64: 256, 6>}, {pipeline_mode = #tpu.pipeline_mode<synchronous>, transform_indices = @transform_4, window_bounds = array<i64: 1, 6>}, {transform_indices = @transform_5, window_bounds = array<i64: 2, 6>}]} {
    %c0 = arith.constant 0 : index
    %c0_0 = arith.constant 0 : index
    %0 = vector.load %arg1[%c0, %c0_0] : memref<2x2592xbf16, #tpu.memory_space<vmem>>, vector<2x2592xbf16>
    %c0_1 = arith.constant 0 : index
    %c0_2 = arith.constant 0 : index
    %1 = vector.load %arg2[%c0_1, %c0_2] : memref<2592x256xbf16, #tpu.memory_space<vmem>>, vector<2592x256xbf16>
    %cst = arith.constant dense<0.000000e+00> : vector<2x256xf32>
    %2 = tpu.matmul %0, %1, %cst {dimension_numbers = #tpu.dot_dimension_numbers<[1], [0], [0], [1], [0, 0, 1, 1], [], []>} : vector<2x2592xbf16>, vector<2592x256xbf16>, vector<2x256xf32> -> vector<2x256xf32>
    %c0_3 = arith.constant 0 : index
    %c0_4 = arith.constant 0 : index
    %3 = vector.load %arg3[%c0_3, %c0_4] : memref<1x256xf32, #tpu.memory_space<vmem>>, vector<1x256xf32>
    %4 = vector.broadcast %3 : vector<1x256xf32> to vector<2x256xf32>
    %5 = arith.addf %2, %4 : vector<2x256xf32>
    %cst_5 = arith.constant 0.000000e+00 : f32
    %6 = vector.broadcast %cst_5 : f32 to vector<2x256xf32>
    %7 = arith.maximumf %5, %6 : vector<2x256xf32>
    %8 = arith.truncf %7 : vector<2x256xf32> to vector<2x256xbf16>
    %c0_6 = arith.constant 0 : index
    %c0_7 = arith.constant 0 : index
    %9 = vector.load %arg4[%c0_6, %c0_7] : memref<256x6xbf16, #tpu.memory_space<vmem>>, vector<256x6xbf16>
    %cst_8 = arith.constant dense<0.000000e+00> : vector<2x6xf32>
    %10 = tpu.matmul %8, %9, %cst_8 {dimension_numbers = #tpu.dot_dimension_numbers<[1], [0], [0], [1], [0, 0, 1, 1], [], []>} : vector<2x256xbf16>, vector<256x6xbf16>, vector<2x6xf32> -> vector<2x6xf32>
    %c0_9 = arith.constant 0 : index
    %c0_10 = arith.constant 0 : index
    %11 = vector.load %arg5[%c0_9, %c0_10] : memref<1x6xf32, #tpu.memory_space<vmem>>, vector<1x6xf32>
    %12 = vector.broadcast %11 : vector<1x6xf32> to vector<2x6xf32>
    %13 = arith.addf %10, %12 : vector<2x6xf32>
    %c0_11 = arith.constant 0 : index
    %c0_12 = arith.constant 0 : index
    %14 = vector.load %arg6[%c0_11, %c0_12] : memref<2x6xf32, #tpu.memory_space<vmem>>, vector<2x6xf32>
    tpu.vector_store %arg6[%c0_11, %c0_12], %13 {strides = array<i32>} : memref<2x6xf32, #tpu.memory_space<vmem>>, vector<2x6xf32>,
    return
  }
  func.func @transform_0(%arg0: i32) -> (i32, i32) {
    %c0_i32 = arith.constant 0 : i32
    %c0_i32_0 = arith.constant 0 : i32
    return %arg0, %c0_i32 : i32, i32
  }
  func.func @transform_1(%arg0: i32) -> (i32, i32) {
    %c0_i32 = arith.constant 0 : i32
    %c0_i32_0 = arith.constant 0 : i32
    %c0_i32_1 = arith.constant 0 : i32
    return %c0_i32, %c0_i32_0 : i32, i32
  }
  func.func @transform_2(%arg0: i32) -> (i32, i32) {
    %c0_i32 = arith.constant 0 : i32
    %c0_i32_0 = arith.constant 0 : i32
    %c0_i32_1 = arith.constant 0 : i32
    return %c0_i32, %c0_i32_0 : i32, i32
  }
  func.func @transform_3(%arg0: i32) -> (i32, i32) {
    %c0_i32 = arith.constant 0 : i32
    %c0_i32_0 = arith.constant 0 : i32
    %c0_i32_1 = arith.constant 0 : i32
    return %c0_i32, %c0_i32_0 : i32, i32
  }
  func.func @transform_4(%arg0: i32) -> (i32, i32) {
    %c0_i32 = arith.constant 0 : i32
    %c0_i32_0 = arith.constant 0 : i32
    %c0_i32_1 = arith.constant 0 : i32
    return %c0_i32, %c0_i32_0 : i32, i32
  }
  func.func @transform_5(%arg0: i32) -> (i32, i32) {
    %c0_i32 = arith.constant 0 : i32
    %c0_i32_0 = arith.constant 0 : i32
    return %arg0, %c0_i32 : i32, i32
  }
}

</mosaic_0001>

<bundles_post_ra>
// kernel: cnn_2c2f_forward.3
= control target key start
LH: loop header
LB: loop body
LE: loop exit
PB: predicated region body
PF: predicated region fallthrough
CT: control target
= control target key end

     0   :  { %s1542_s12 = smov 0   ;;  %s1852_s0 = inlined_call_operand.vmem [shape: bf16[800,256], index: 0, kind: input, shape index: {}]   ;;  %s1853_s1 = inlined_call_operand.vmem [shape: bf16[256,16], index: 1, kind: input, shape index: {}]   ;;  %s1854_s2 = inlined_call_operand.vmem [shape: f32[1,16], index: 2, kind: input, shape index: {}]   ;;  %s1855_s3 = inlined_call_operand.vmem [shape: bf16[800,16], index: 3, kind: output, shape index: {}]  }
   0x1 LB: > { %s1203_s13 = sadd.s32 4294967295, %s1519_s12   ;;  %p1207_p0 = scmp.ge.s32.totalorder %s1519_s12, 1  ;;  %s1519_s12 = sphi %s1542_s12, %s13_s12  }
   0x2   : > { %p139_p1 = scmp.lt.s32.totalorder %s1519_s12, 3 }
   0x4   : > { %p140_p2 = pnand %p1207_p0, %p139_p1 }
   0x5   : > { %v1422_v0 = vld [vmem:[%s1853_s1] sm:$0xff] (!%p140_p2)   ;;  %v1521_v1 = vmov (!%p140_p2), 0   ;;  %s164_s16 = smul.u32 (!%p140_p2), 50, %s1203_s13  ;;  %v1423_v2 = vld [vmem:[%s1853_s1 + $0x8] sm:$0xff] (!%p140_p2)   ;;  %v1424_v3 = vld [vmem:[%s1853_s1 + $0x10] sm:$0xff] (!%p140_p2)   ;;  %vm1096_vm0 = vcmask (!%p140_p2), 125952  }
   0x6   : > { %143 = sbr.rel (%p140_p2) target bundleno = 387 (0x183), region = 32  ;;  %613 = vmatprep.subr.bf16.mxu0 (!%p140_p2), %v1521_v1  ;;  %1381 = vmatprep.subr.bf16.mxu1 (!%p140_p2), %v1521_v1  ;;  %v1425_v4 = vld [vmem:[%s1853_s1 + $0x18] sm:$0xff] (!%p140_p2)   ;;  %v1426_v5 = vld [vmem:[%s1853_s1 + $0x20] sm:$0xff] (!%p140_p2)   ;;  %v1427_v7 = vld [vmem:[%s1853_s1 + $0x28] sm:$0xff] (!%p140_p2)  }
   0x7   : > { %614 = vmatpush1.bf16.msra.mxu0 (!%p140_p2), %v1422_v0  ;;  %1397 = vmatpush1.bf16.msra.mxu1 (!%p140_p2), %v1422_v0  ;;  %p165_p3 = scmp.lt.s32.totalorder (!%p140_p2), %s164_s16, 99  ;;  %v1428_v9 = vld [vmem:[%s1853_s1 + $0x30] sm:$0xff] (!%p140_p2)   ;;  %v1429_v10 = vld [vmem:[%s1853_s1 + $0x38] sm:$0xff] (!%p140_p2)   ;;  %v1430_v11 = vld [vmem:[%s1853_s1 + $0x40] sm:$0xff] (!%p140_p2)  }
   0x8   : > { %615 = vmatprep.subr.bf16.mxu0 (!%p140_p2), %v1521_v1  ;;  %1382 = vmatprep.subr.bf16.mxu1 (!%p140_p2), %v1521_v1  ;;  %v1431_v12 = vld [vmem:[%s1853_s1 + $0x48] sm:$0xff] (!%p140_p2)   ;;  %v1432_v13 = vld [vmem:[%s1853_s1 + $0x50] sm:$0xff] (!%p140_p2)   ;;  %v1433_v14 = vld [vmem:[%s1853_s1 + $0x58] sm:$0xff] (!%p140_p2)  }
   0x9   : > { %v1434_v15 = vld [vmem:[%s1853_s1 + $0x60] sm:$0xff] (!%p140_p2)   ;;  %v1435_v16 = vld [vmem:[%s1853_s1 + $0x68] sm:$0xff] (!%p140_p2)   ;;  %v1436_v17 = vld [vmem:[%s1853_s1 + $0x70] sm:$0xff] (!%p140_p2)  }
   0xa   : > { %v1437_v18 = vld [vmem:[%s1853_s1 + $0x78] sm:$0xff] (!%p140_p2)  }
   0xb   : > { %616 = vmatpush1.bf16.msra.mxu0 (!%p140_p2), %v1423_v2  ;;  %1398 = vmatpush1.bf16.msra.mxu1 (!%p140_p2), %v1423_v2 }
   0xc   : > { %617 = vmatprep.subr.bf16.mxu0 (!%p140_p2), %v1521_v1  ;;  %1383 = vmatprep.subr.bf16.mxu1 (!%p140_p2), %v1521_v1 }
   0xd   : > { %s1857_s16 = smov (!%p165_p3, %s164_s16), 99 }
   0xe   : > { %s1330_s23 = sshll.u32 %s1857_s16, 3  ;;  %s1210_s29 = sshll.u32 %s1857_s16, 2 }
   0xf   : > { %618 = vmatpush1.bf16.msra.mxu0 %v1424_v3  ;;  %1399 = vmatpush1.bf16.msra.mxu1 %v1424_v3  ;;  %s1579_s28 = scalar_lea.vmem %s1852_s0, %s1330_s23  ;;  %v1691_v3 = vld [vmem:[%s1854_s2] ss:$0 sm:$0xff]  ;;  %s1701_s16 = scalar_lea.vmem %s1855_s3, %s1210_s29 }
  0x10   : > { %619 = vmatprep.subr.bf16.mxu0 %v1521_v1  ;;  %1384 = vmatprep.subr.bf16.mxu1 %v1521_v1  ;;  %v1440_v6 = vld [vmem:[%s1579_s28 + $0x4] ss:$8 sps:$4 sm:$0xff]   ;;  %v1443_v8 = vld [vmem:[%s1579_s28 + $0xd4] ss:$8 sps:$4 sm:$0xff]   ;;  %v1438_v19 = vld [vmem:[%s1579_s28] ss:$8 sps:$4 sm:$0xff]  }
  0x11   : > { %645 = vmatprep.mubr.bf16.mxu0 %v1440_v6  ;;  %749 = vmatprep.mubr.bf16.mxu1 %v1443_v8  ;;  %v1441_v20 = vld [vmem:[%s1579_s28 + $0xd0] ss:$8 sps:$4 sm:$0xff]   ;;  %v1444_v21 = vld [vmem:[%s1579_s28 + $0x14] ss:$8 sps:$4 sm:$0xff]   ;;  %v1447_v22 = vld [vmem:[%s1579_s28 + $0xe4] ss:$8 sps:$4 sm:$0xff]  }
  0x12   : > { %v1446_v23 = vld [vmem:[%s1579_s28 + $0x10] ss:$8 sps:$4 sm:$0xff]   ;;  %v1449_v24 = vld [vmem:[%s1579_s28 + $0xe0] ss:$8 sps:$4 sm:$0xff]   ;;  %v1450_v25 = vld [vmem:[%s1579_s28 + $0x24] ss:$8 sps:$4 sm:$0xff]  }
  0x13   : > { %620 = vmatpush1.bf16.msra.mxu0 %v1425_v4  ;;  %1400 = vmatpush1.bf16.msra.mxu1 %v1425_v4  ;;  %v1453_v26 = vld [vmem:[%s1579_s28 + $0xf4] ss:$8 sps:$4 sm:$0xff]   ;;  %v1452_v27 = vld [vmem:[%s1579_s28 + $0x20] ss:$8 sps:$4 sm:$0xff]   ;;  %v1455_v28 = vld [vmem:[%s1579_s28 + $0xf0] ss:$8 sps:$4 sm:$0xff]  }
  0x14   : > { %621 = vmatprep.subr.bf16.mxu0 %v1521_v1  ;;  %1385 = vmatprep.subr.bf16.mxu1 %v1521_v1  ;;  %v1456_v29 = vld [vmem:[%s1579_s28 + $0x34] ss:$8 sps:$4 sm:$0xff]   ;;  %v1459_v30 = vld [vmem:[%s1579_s28 + $0x104] ss:$8 sps:$4 sm:$0xff]   ;;  %v1458_v31 = vld [vmem:[%s1579_s28 + $0x30] ss:$8 sps:$4 sm:$0xff]  }
  0x15   : > { %v1461_v32 = vld [vmem:[%s1579_s28 + $0x100] ss:$8 sps:$4 sm:$0xff]   ;;  %v1462_v33 = vld [vmem:[%s1579_s28 + $0x44] ss:$8 sps:$4 sm:$0xff]   ;;  %v1465_v34 = vld [vmem:[%s1579_s28 + $0x114] ss:$8 sps:$4 sm:$0xff]  }
  0x16   : > { %v1464_v35 = vld [vmem:[%s1579_s28 + $0x40] ss:$8 sps:$4 sm:$0xff]   ;;  %v1467_v36 = vld [vmem:[%s1579_s28 + $0x110] ss:$8 sps:$4 sm:$0xff]   ;;  %v1468_v37 = vld [vmem:[%s1579_s28 + $0x54] ss:$8 sps:$4 sm:$0xff]  }
  0x17   : > { %622 = vmatpush1.bf16.msra.mxu0 %v1426_v5  ;;  %1401 = vmatpush1.bf16.msra.mxu1 %v1426_v5  ;;  %v1471_v38 = vld [vmem:[%s1579_s28 + $0x124] ss:$8 sps:$4 sm:$0xff]   ;;  %v1470_v39 = vld [vmem:[%s1579_s28 + $0x50] ss:$8 sps:$4 sm:$0xff]   ;;  %v1473_v40 = vld [vmem:[%s1579_s28 + $0x120] ss:$8 sps:$4 sm:$0xff]  }
  0x18   : > { %623 = vmatprep.subr.bf16.mxu0 %v1521_v1  ;;  %1386 = vmatprep.subr.bf16.mxu1 %v1521_v1  ;;  %v1474_v41 = vld [vmem:[%s1579_s28 + $0x64] ss:$8 sps:$4 sm:$0xff]   ;;  %v1477_v42 = vld [vmem:[%s1579_s28 + $0x134] ss:$8 sps:$4 sm:$0xff]   ;;  %v1476_v43 = vld [vmem:[%s1579_s28 + $0x60] ss:$8 sps:$4 sm:$0xff]  }
  0x19   : > { %v1479_v44 = vld [vmem:[%s1579_s28 + $0x130] ss:$8 sps:$4 sm:$0xff]   ;;  %v1480_v45 = vld [vmem:[%s1579_s28 + $0x74] ss:$8 sps:$4 sm:$0xff]   ;;  %v1483_v46 = vld [vmem:[%s1579_s28 + $0x144] ss:$8 sps:$4 sm:$0xff]  }
  0x1a   : > { %v1482_v47 = vld [vmem:[%s1579_s28 + $0x70] ss:$8 sps:$4 sm:$0xff]   ;;  %v1485_v48 = vld [vmem:[%s1579_s28 + $0x140] ss:$8 sps:$4 sm:$0xff]   ;;  %v1486_v49 = vld [vmem:[%s1579_s28 + $0x84] ss:$8 sps:$4 sm:$0xff]  }
  0x1b   : > { %624 = vmatpush1.bf16.msra.mxu0 %v1427_v7  ;;  %1402 = vmatpush1.bf16.msra.mxu1 %v1427_v7  ;;  %v1489_v50 = vld [vmem:[%s1579_s28 + $0x154] ss:$8 sps:$4 sm:$0xff]   ;;  %v1488_v51 = vld [vmem:[%s1579_s28 + $0x80] ss:$8 sps:$4 sm:$0xff]   ;;  %v1491_v52 = vld [vmem:[%s1579_s28 + $0x150] ss:$8 sps:$4 sm:$0xff]  }
  0x1c   : > { %625 = vmatprep.subr.bf16.mxu0 %v1521_v1  ;;  %1387 = vmatprep.subr.bf16.mxu1 %v1521_v1  ;;  %v1492_v53 = vld [vmem:[%s1579_s28 + $0x94] ss:$8 sps:$4 sm:$0xff]   ;;  %v1495_v54 = vld [vmem:[%s1579_s28 + $0x164] ss:$8 sps:$4 sm:$0xff]   ;;  %v1494_v55 = vld [vmem:[%s1579_s28 + $0x90] ss:$8 sps:$4 sm:$0xff]  }
  0x1d   : > { %v1497_v56 = vld [vmem:[%s1579_s28 + $0x160] ss:$8 sps:$4 sm:$0xff]   ;;  %v1498_v57 = vld [vmem:[%s1579_s28 + $0xa4] ss:$8 sps:$4 sm:$0xff]   ;;  %v1501_v58 = vld [vmem:[%s1579_s28 + $0x174] ss:$8 sps:$4 sm:$0xff]  }
  0x1e   : > { %v1500_v59 = vld [vmem:[%s1579_s28 + $0xa0] ss:$8 sps:$4 sm:$0xff]   ;;  %v1503_v60 = vld [vmem:[%s1579_s28 + $0x170] ss:$8 sps:$4 sm:$0xff]   ;;  %v1504_v61 = vld [vmem:[%s1579_s28 + $0xb4] ss:$8 sps:$4 sm:$0xff]  }
  0x1f   : > { %626 = vmatpush1.bf16.msra.mxu0 %v1428_v9  ;;  %1403 = vmatpush1.bf16.msra.mxu1 %v1428_v9  ;;  %v1507_v62 = vld [vmem:[%s1579_s28 + $0x184] ss:$8 sps:$4 sm:$0xff]   ;;  %v1506_v63 = vld [vmem:[%s1579_s28 + $0xb0] ss:$8 sps:$4 sm:$0xff]   ;;  %v1509_v0 = vld [vmem:[%s1579_s28 + $0x180] ss:$8 sps:$4 sm:$0xff]  }
  0x20   : > { %627 = vmatprep.subr.bf16.mxu0 %v1521_v1  ;;  %1388 = vmatprep.subr.bf16.mxu1 %v1521_v1  ;;  %v1512_v2 = vld [vmem:[%s1579_s28 + $0xc0] ss:$8 sps:$4 sm:$0xff]  }
  0x23   : > { %628 = vmatpush1.bf16.msra.mxu0 %v1429_v10  ;;  %1404 = vmatpush1.bf16.msra.mxu1 %v1429_v10 }
  0x24   : > { %629 = vmatprep.subr.bf16.mxu0 %v1521_v1  ;;  %1389 = vmatprep.subr.bf16.mxu1 %v1521_v1 }
  0x27   : > { %630 = vmatpush1.bf16.msra.mxu0 %v1430_v11  ;;  %1405 = vmatpush1.bf16.msra.mxu1 %v1430_v11 }
  0x28   : > { %631 = vmatprep.subr.bf16.mxu0 %v1521_v1  ;;  %1390 = vmatprep.subr.bf16.mxu1 %v1521_v1 }
  0x2b   : > { %632 = vmatpush1.bf16.msra.mxu0 %v1431_v12  ;;  %1406 = vmatpush1.bf16.msra.mxu1 %v1431_v12 }
  0x2c   : > { %633 = vmatprep.subr.bf16.mxu0 %v1521_v1  ;;  %1391 = vmatprep.subr.bf16.mxu1 %v1521_v1 }
  0x2f   : > { %634 = vmatpush1.bf16.msra.mxu0 %v1432_v13  ;;  %1407 = vmatpush1.bf16.msra.mxu1 %v1432_v13 }
  0x30   : > { %635 = vmatprep.subr.bf16.mxu0 %v1521_v1  ;;  %1392 = vmatprep.subr.bf16.mxu1 %v1521_v1 }
  0x33   : > { %636 = vmatpush1.bf16.msra.mxu0 %v1433_v14  ;;  %1408 = vmatpush1.bf16.msra.mxu1 %v1433_v14 }
  0x34   : > { %637 = vmatprep.subr.bf16.mxu0 %v1521_v1  ;;  %1393 = vmatprep.subr.bf16.mxu1 %v1521_v1 }
  0x37   : > { %638 = vmatpush1.bf16.msra.mxu0 %v1434_v15  ;;  %1409 = vmatpush1.bf16.msra.mxu1 %v1434_v15 }
  0x38   : > { %639 = vmatprep.subr.bf16.mxu0 %v1521_v1  ;;  %1394 = vmatprep.subr.bf16.mxu1 %v1521_v1 }
  0x3b   : > { %640 = vmatpush1.bf16.msra.mxu0 %v1435_v16  ;;  %1410 = vmatpush1.bf16.msra.mxu1 %v1435_v16 }
  0x3c   : > { %641 = vmatprep.subr.bf16.mxu0 %v1521_v1  ;;  %1395 = vmatprep.subr.bf16.mxu1 %v1521_v1 }
  0x3f   : > { %642 = vmatpush1.bf16.msra.mxu0 %v1436_v17  ;;  %1411 = vmatpush1.bf16.msra.mxu1 %v1436_v17 }
  0x40   : > { %643 = vmatprep.subr.bf16.mxu0 %v1521_v1  ;;  %1396 = vmatprep.subr.bf16.mxu1 %v1521_v1  ;;  %v1510_v1 = vld [vmem:[%s1579_s28 + $0xc4] ss:$8 sps:$4 sm:$0xff]  }
  0x43   : > { %644 = vmatpush1.bf16.msra.mxu0 %v1437_v18  ;;  %1412 = vmatpush1.bf16.msra.mxu1 %v1437_v18 }
  0x46   : > { %646 = vmatmul.mubr.bf16.vlgmr.msra.gmra.mrb[0].mxu0 %v1438_v19  ;;  %750 = vmatmul.mubr.bf16.vlgmr.msra.gmra.mrb[0].mxu1 %v1441_v20 }
  0x47   : > { %653 = vmatprep.mubr.bf16.mxu0 %v1444_v21  ;;  %757 = vmatprep.mubr.bf16.mxu1 %v1447_v22 }
  0x4e   : > { %654 = vmatmul.mubr.bf16.gmra.mrb[4].mxu0 %v1446_v23  ;;  %758 = vmatmul.mubr.bf16.gmra.mrb[4].mxu1 %v1449_v24 }
  0x4f   : > { %661 = vmatprep.mubr.bf16.mxu0 %v1450_v25  ;;  %765 = vmatprep.mubr.bf16.mxu1 %v1453_v26 }
  0x56   : > { %662 = vmatmul.mubr.bf16.gmra.mrb[8].mxu0 %v1452_v27  ;;  %766 = vmatmul.mubr.bf16.gmra.mrb[8].mxu1 %v1455_v28 }
  0x57   : > { %669 = vmatprep.mubr.bf16.mxu0 %v1456_v29  ;;  %773 = vmatprep.mubr.bf16.mxu1 %v1459_v30 }
  0x5e   : > { %670 = vmatmul.mubr.bf16.gmra.mrb[12].mxu0 %v1458_v31  ;;  %774 = vmatmul.mubr.bf16.gmra.mrb[12].mxu1 %v1461_v32 }
  0x5f   : > { %677 = vmatprep.mubr.bf16.mxu0 %v1462_v33  ;;  %781 = vmatprep.mubr.bf16.mxu1 %v1465_v34 }
  0x66   : > { %678 = vmatmul.mubr.bf16.gmra.mrb[16].mxu0 %v1464_v35  ;;  %782 = vmatmul.mubr.bf16.gmra.mrb[16].mxu1 %v1467_v36 }
  0x67   : > { %685 = vmatprep.mubr.bf16.mxu0 %v1468_v37  ;;  %789 = vmatprep.mubr.bf16.mxu1 %v1471_v38 }
  0x6e   : > { %686 = vmatmul.mubr.bf16.gmra.mrb[20].mxu0 %v1470_v39  ;;  %790 = vmatmul.mubr.bf16.gmra.mrb[20].mxu1 %v1473_v40 }
  0x6f   : > { %693 = vmatprep.mubr.bf16.mxu0 %v1474_v41  ;;  %797 = vmatprep.mubr.bf16.mxu1 %v1477_v42 }
  0x76   : > { %694 = vmatmul.mubr.bf16.gmra.mrb[24].mxu0 %v1476_v43  ;;  %798 = vmatmul.mubr.bf16.gmra.mrb[24].mxu1 %v1479_v44 }
  0x77   : > { %701 = vmatprep.mubr.bf16.mxu0 %v1480_v45  ;;  %805 = vmatprep.mubr.bf16.mxu1 %v1483_v46 }
  0x7e   : > { %702 = vmatmul.mubr.bf16.gmra.mrb[28].mxu0 %v1482_v47  ;;  %806 = vmatmul.mubr.bf16.gmra.mrb[28].mxu1 %v1485_v48 }
  0x7f   : > { %709 = vmatprep.mubr.bf16.mxu0 %v1486_v49  ;;  %813 = vmatprep.mubr.bf16.mxu1 %v1489_v50 }
  0x86   : > { %710 = vmatmul.mubr.bf16.gmra.mrb[32].mxu0 %v1488_v51  ;;  %814 = vmatmul.mubr.bf16.gmra.mrb[32].mxu1 %v1491_v52 }
  0x87   : > { %717 = vmatprep.mubr.bf16.mxu0 %v1492_v53  ;;  %821 = vmatprep.mubr.bf16.mxu1 %v1495_v54 }
  0x8e   : > { %718 = vmatmul.mubr.bf16.gmra.mrb[36].mxu0 %v1494_v55  ;;  %822 = vmatmul.mubr.bf16.gmra.mrb[36].mxu1 %v1497_v56 }
  0x8f   : > { %725 = vmatprep.mubr.bf16.mxu0 %v1498_v57  ;;  %829 = vmatprep.mubr.bf16.mxu1 %v1501_v58 }
  0x96   : > { %726 = vmatmul.mubr.bf16.gmra.mrb[40].mxu0 %v1500_v59  ;;  %830 = vmatmul.mubr.bf16.gmra.mrb[40].mxu1 %v1503_v60 }
  0x97   : > { %733 = vmatprep.mubr.bf16.mxu0 %v1504_v61  ;;  %837 = vmatprep.mubr.bf16.mxu1 %v1507_v62 }
  0x9e   : > { %734 = vmatmul.mubr.bf16.gmra.mrb[44].mxu0 %v1506_v63  ;;  %838 = vmatmul.mubr.bf16.gmra.mrb[44].mxu1 %v1509_v0 }
  0x9f   : > { %741 = vmatprep.mubr.bf16.mxu0 %v1510_v1 }
  0xa6   : > { %742 = vmatmul.mubr.bf16.gmra.mrb[48].mxu0 %v1512_v2 }
 0x119   : > { %v647_v4 = vpop.f32.mrb[0].mxu0  ;;  %v751_v5 = vpop.f32.mrb[0].mxu1 }
 0x11a   : > { %v648_v6 = vadd.f32 %v1691_v3, %v647_v4  ;;  %v649_v7 = vpop.f32.mrb[1].mxu0  ;;  %v752_v8 = vadd.f32 %v1691_v3, %v751_v5  ;;  %v753_v9 = vpop.f32.mrb[1].mxu1 }
 0x11b   : > { %v650_v10 = vpop.f32.mrb[2].mxu0  ;;  %v754_v11 = vpop.f32.mrb[2].mxu1 }
 0x11c   : > { %v846_v12 = vmax.f32 %v648_v6, 0.0  ;;  %v651_v13 = vadd.f32 %v1691_v3, %v650_v10  ;;  %v652_v14 = vpop.f32.mrb[3].mxu0  ;;  %v872_v15 = vmax.f32 %v752_v8, 0.0  ;;  %v755_v16 = vadd.f32 %v1691_v3, %v754_v11  ;;  %v756_v17 = vpop.f32.mrb[3].mxu1 }
 0x11e   : > { %v1331_v18 = vpack.c.bf16 %v846_v12, %v846_v12  ;;  %v847_v19 = vmax.f32 %v651_v13, 0.0  ;;  %v1357_v20 = vpack.c.bf16 %v872_v15, %v872_v15  ;;  %v873_v21 = vmax.f32 %v755_v16, 0.0 }
 0x120   : > { %1097 = vst.msk [vmem:[%s1701_s16] sm:$0xf] %vm1096_vm0, %v1331_v18  ;;  %v1332_v22 = vpack.c.bf16 %v847_v19, %v847_v19  ;;  %1123 = vst.msk [vmem:[%s1701_s16 + $0x68] sm:$0xf] %vm1096_vm0, %v1357_v20  ;;  %v1358_v23 = vpack.c.bf16 %v873_v21, %v873_v21 }
 0x121   : > { %v655_v24 = vpop.f32.mrb[4].mxu0  ;;  %v759_v25 = vpop.f32.mrb[4].mxu1 }
 0x122   : > { %1098 = vst.msk [vmem:[%s1701_s16 + $0x4] sm:$0xf] %vm1096_vm0, %v1332_v22  ;;  %1124 = vst.msk [vmem:[%s1701_s16 + $0x6c] sm:$0xf] %vm1096_vm0, %v1358_v23  ;;  %v656_v26 = vadd.f32 %v1691_v3, %v655_v24  ;;  %v657_v27 = vpop.f32.mrb[5].mxu0  ;;  %v760_v28 = vadd.f32 %v1691_v3, %v759_v25  ;;  %v761_v29 = vpop.f32.mrb[5].mxu1 }
 0x123   : > { %v658_v30 = vpop.f32.mrb[6].mxu0  ;;  %v762_v31 = vpop.f32.mrb[6].mxu1 }
 0x124   : > { %v848_v32 = vmax.f32 %v656_v26, 0.0  ;;  %v659_v33 = vadd.f32 %v1691_v3, %v658_v30  ;;  %v660_v34 = vpop.f32.mrb[7].mxu0  ;;  %v874_v35 = vmax.f32 %v760_v28, 0.0  ;;  %v763_v36 = vadd.f32 %v1691_v3, %v762_v31  ;;  %v764_v37 = vpop.f32.mrb[7].mxu1 }
 0x126   : > { %v1333_v38 = vpack.c.bf16 %v848_v32, %v848_v32  ;;  %v849_v39 = vmax.f32 %v659_v33, 0.0  ;;  %v1359_v40 = vpack.c.bf16 %v874_v35, %v874_v35  ;;  %v875_v41 = vmax.f32 %v763_v36, 0.0 }
 0x128   : > { %1099 = vst.msk [vmem:[%s1701_s16 + $0x8] sm:$0xf] %vm1096_vm0, %v1333_v38  ;;  %v1334_v42 = vpack.c.bf16 %v849_v39, %v849_v39  ;;  %1125 = vst.msk [vmem:[%s1701_s16 + $0x70] sm:$0xf] %vm1096_vm0, %v1359_v40  ;;  %v1360_v43 = vpack.c.bf16 %v875_v41, %v875_v41 }
 0x129   : > { %v663_v44 = vpop.f32.mrb[8].mxu0  ;;  %v767_v45 = vpop.f32.mrb[8].mxu1 }
 0x12a   : > { %1100 = vst.msk [vmem:[%s1701_s16 + $0xc] sm:$0xf] %vm1096_vm0, %v1334_v42  ;;  %1126 = vst.msk [vmem:[%s1701_s16 + $0x74] sm:$0xf] %vm1096_vm0, %v1360_v43  ;;  %v664_v46 = vadd.f32 %v1691_v3, %v663_v44  ;;  %v665_v47 = vpop.f32.mrb[9].mxu0  ;;  %v768_v48 = vadd.f32 %v1691_v3, %v767_v45  ;;  %v769_v49 = vpop.f32.mrb[9].mxu1 }
 0x12b   : > { %v666_v50 = vpop.f32.mrb[10].mxu0  ;;  %v770_v51 = vpop.f32.mrb[10].mxu1 }
 0x12c   : > { %v850_v52 = vmax.f32 %v664_v46, 0.0  ;;  %v667_v53 = vadd.f32 %v1691_v3, %v666_v50  ;;  %v668_v54 = vpop.f32.mrb[11].mxu0  ;;  %v876_v55 = vmax.f32 %v768_v48, 0.0  ;;  %v771_v56 = vadd.f32 %v1691_v3, %v770_v51  ;;  %v772_v57 = vpop.f32.mrb[11].mxu1 }
 0x12e   : > { %v1335_v58 = vpack.c.bf16 %v850_v52, %v850_v52  ;;  %v851_v59 = vmax.f32 %v667_v53, 0.0  ;;  %v1361_v60 = vpack.c.bf16 %v876_v55, %v876_v55  ;;  %v877_v61 = vmax.f32 %v771_v56, 0.0 }
 0x130   : > { %1101 = vst.msk [vmem:[%s1701_s16 + $0x10] sm:$0xf] %vm1096_vm0, %v1335_v58  ;;  %v1336_v62 = vpack.c.bf16 %v851_v59, %v851_v59  ;;  %1127 = vst.msk [vmem:[%s1701_s16 + $0x78] sm:$0xf] %vm1096_vm0, %v1361_v60  ;;  %v1362_v63 = vpack.c.bf16 %v877_v61, %v877_v61 }
 0x131   : > { %v671_v0 = vpop.f32.mrb[12].mxu0  ;;  %v775_v1 = vpop.f32.mrb[12].mxu1 }
 0x132   : > { %1102 = vst.msk [vmem:[%s1701_s16 + $0x14] sm:$0xf] %vm1096_vm0, %v1336_v62  ;;  %1128 = vst.msk [vmem:[%s1701_s16 + $0x7c] sm:$0xf] %vm1096_vm0, %v1362_v63  ;;  %v672_v2 = vadd.f32 %v1691_v3, %v671_v0  ;;  %v673_v4 = vpop.f32.mrb[13].mxu0  ;;  %v776_v5 = vadd.f32 %v1691_v3, %v775_v1  ;;  %v777_v6 = vpop.f32.mrb[13].mxu1 }
 0x133   : > { %v674_v7 = vpop.f32.mrb[14].mxu0  ;;  %v778_v8 = vpop.f32.mrb[14].mxu1 }
 0x134   : > { %v852_v9 = vmax.f32 %v672_v2, 0.0  ;;  %v675_v10 = vadd.f32 %v1691_v3, %v674_v7  ;;  %v676_v11 = vpop.f32.mrb[15].mxu0  ;;  %v878_v12 = vmax.f32 %v776_v5, 0.0  ;;  %v779_v13 = vadd.f32 %v1691_v3, %v778_v8  ;;  %v780_v14 = vpop.f32.mrb[15].mxu1 }
 0x136   : > { %v1337_v15 = vpack.c.bf16 %v852_v9, %v852_v9  ;;  %v853_v16 = vmax.f32 %v675_v10, 0.0  ;;  %v1363_v17 = vpack.c.bf16 %v878_v12, %v878_v12  ;;  %v879_v18 = vmax.f32 %v779_v13, 0.0 }
 0x138   : > { %1103 = vst.msk [vmem:[%s1701_s16 + $0x18] sm:$0xf] %vm1096_vm0, %v1337_v15  ;;  %v1338_v19 = vpack.c.bf16 %v853_v16, %v853_v16  ;;  %1129 = vst.msk [vmem:[%s1701_s16 + $0x80] sm:$0xf] %vm1096_vm0, %v1363_v17  ;;  %v1364_v20 = vpack.c.bf16 %v879_v18, %v879_v18 }
 0x139   : > { %v679_v21 = vpop.f32.mrb[16].mxu0  ;;  %v783_v22 = vpop.f32.mrb[16].mxu1 }
 0x13a   : > { %1104 = vst.msk [vmem:[%s1701_s16 + $0x1c] sm:$0xf] %vm1096_vm0, %v1338_v19  ;;  %1130 = vst.msk [vmem:[%s1701_s16 + $0x84] sm:$0xf] %vm1096_vm0, %v1364_v20  ;;  %v680_v23 = vadd.f32 %v1691_v3, %v679_v21  ;;  %v681_v24 = vpop.f32.mrb[17].mxu0  ;;  %v784_v25 = vadd.f32 %v1691_v3, %v783_v22  ;;  %v785_v26 = vpop.f32.mrb[17].mxu1 }
 0x13b   : > { %v682_v27 = vpop.f32.mrb[18].mxu0  ;;  %v786_v28 = vpop.f32.mrb[18].mxu1 }
 0x13c   : > { %v854_v29 = vmax.f32 %v680_v23, 0.0  ;;  %v683_v30 = vadd.f32 %v1691_v3, %v682_v27  ;;  %v684_v31 = vpop.f32.mrb[19].mxu0  ;;  %v880_v32 = vmax.f32 %v784_v25, 0.0  ;;  %v787_v33 = vadd.f32 %v1691_v3, %v786_v28  ;;  %v788_v34 = vpop.f32.mrb[19].mxu1 }
 0x13e   : > { %v1339_v35 = vpack.c.bf16 %v854_v29, %v854_v29  ;;  %v855_v36 = vmax.f32 %v683_v30, 0.0  ;;  %v1365_v37 = vpack.c.bf16 %v880_v32, %v880_v32  ;;  %v881_v38 = vmax.f32 %v787_v33, 0.0 }
 0x140   : > { %1105 = vst.msk [vmem:[%s1701_s16 + $0x20] sm:$0xf] %vm1096_vm0, %v1339_v35  ;;  %v1340_v39 = vpack.c.bf16 %v855_v36, %v855_v36  ;;  %1131 = vst.msk [vmem:[%s1701_s16 + $0x88] sm:$0xf] %vm1096_vm0, %v1365_v37  ;;  %v1366_v40 = vpack.c.bf16 %v881_v38, %v881_v38 }
 0x141   : > { %v687_v41 = vpop.f32.mrb[20].mxu0  ;;  %v791_v42 = vpop.f32.mrb[20].mxu1 }
 0x142   : > { %1106 = vst.msk [vmem:[%s1701_s16 + $0x24] sm:$0xf] %vm1096_vm0, %v1340_v39  ;;  %1132 = vst.msk [vmem:[%s1701_s16 + $0x8c] sm:$0xf] %vm1096_vm0, %v1366_v40  ;;  %v688_v43 = vadd.f32 %v1691_v3, %v687_v41  ;;  %v689_v44 = vpop.f32.mrb[21].mxu0  ;;  %v792_v45 = vadd.f32 %v1691_v3, %v791_v42  ;;  %v793_v46 = vpop.f32.mrb[21].mxu1 }
 0x143   : > { %v690_v47 = vpop.f32.mrb[22].mxu0  ;;  %v794_v48 = vpop.f32.mrb[22].mxu1 }
 0x144   : > { %v856_v49 = vmax.f32 %v688_v43, 0.0  ;;  %v691_v50 = vadd.f32 %v1691_v3, %v690_v47  ;;  %v692_v51 = vpop.f32.mrb[23].mxu0  ;;  %v882_v52 = vmax.f32 %v792_v45, 0.0  ;;  %v795_v53 = vadd.f32 %v1691_v3, %v794_v48  ;;  %v796_v54 = vpop.f32.mrb[23].mxu1 }
 0x146   : > { %v1341_v55 = vpack.c.bf16 %v856_v49, %v856_v49  ;;  %v857_v56 = vmax.f32 %v691_v50, 0.0  ;;  %v1367_v57 = vpack.c.bf16 %v882_v52, %v882_v52  ;;  %v883_v58 = vmax.f32 %v795_v53, 0.0 }
 0x148   : > { %1107 = vst.msk [vmem:[%s1701_s16 + $0x28] sm:$0xf] %vm1096_vm0, %v1341_v55  ;;  %v1342_v59 = vpack.c.bf16 %v857_v56, %v857_v56  ;;  %1133 = vst.msk [vmem:[%s1701_s16 + $0x90] sm:$0xf] %vm1096_vm0, %v1367_v57  ;;  %v1368_v60 = vpack.c.bf16 %v883_v58, %v883_v58 }
 0x149   : > { %v695_v61 = vpop.f32.mrb[24].mxu0  ;;  %v799_v62 = vpop.f32.mrb[24].mxu1 }
 0x14a   : > { %1108 = vst.msk [vmem:[%s1701_s16 + $0x2c] sm:$0xf] %vm1096_vm0, %v1342_v59  ;;  %1134 = vst.msk [vmem:[%s1701_s16 + $0x94] sm:$0xf] %vm1096_vm0, %v1368_v60  ;;  %v696_v63 = vadd.f32 %v1691_v3, %v695_v61  ;;  %v697_v0 = vpop.f32.mrb[25].mxu0  ;;  %v800_v1 = vadd.f32 %v1691_v3, %v799_v62  ;;  %v801_v2 = vpop.f32.mrb[25].mxu1 }
 0x14b   : > { %v698_v4 = vpop.f32.mrb[26].mxu0  ;;  %v802_v5 = vpop.f32.mrb[26].mxu1 }
 0x14c   : > { %v858_v6 = vmax.f32 %v696_v63, 0.0  ;;  %v699_v7 = vadd.f32 %v1691_v3, %v698_v4  ;;  %v700_v8 = vpop.f32.mrb[27].mxu0  ;;  %v884_v9 = vmax.f32 %v800_v1, 0.0  ;;  %v803_v10 = vadd.f32 %v1691_v3, %v802_v5  ;;  %v804_v11 = vpop.f32.mrb[27].mxu1 }
 0x14e   : > { %v1343_v12 = vpack.c.bf16 %v858_v6, %v858_v6  ;;  %v859_v13 = vmax.f32 %v699_v7, 0.0  ;;  %v1369_v14 = vpack.c.bf16 %v884_v9, %v884_v9  ;;  %v885_v15 = vmax.f32 %v803_v10, 0.0 }
 0x150   : > { %1109 = vst.msk [vmem:[%s1701_s16 + $0x30] sm:$0xf] %vm1096_vm0, %v1343_v12  ;;  %v1344_v16 = vpack.c.bf16 %v859_v13, %v859_v13  ;;  %1135 = vst.msk [vmem:[%s1701_s16 + $0x98] sm:$0xf] %vm1096_vm0, %v1369_v14  ;;  %v1370_v17 = vpack.c.bf16 %v885_v15, %v885_v15 }
 0x151   : > { %v703_v18 = vpop.f32.mrb[28].mxu0  ;;  %v807_v19 = vpop.f32.mrb[28].mxu1 }
 0x152   : > { %1110 = vst.msk [vmem:[%s1701_s16 + $0x34] sm:$0xf] %vm1096_vm0, %v1344_v16  ;;  %1136 = vst.msk [vmem:[%s1701_s16 + $0x9c] sm:$0xf] %vm1096_vm0, %v1370_v17  ;;  %v704_v20 = vadd.f32 %v1691_v3, %v703_v18  ;;  %v705_v21 = vpop.f32.mrb[29].mxu0  ;;  %v808_v22 = vadd.f32 %v1691_v3, %v807_v19  ;;  %v809_v23 = vpop.f32.mrb[29].mxu1 }
 0x153   : > { %v706_v24 = vpop.f32.mrb[30].mxu0  ;;  %v810_v25 = vpop.f32.mrb[30].mxu1 }
 0x154   : > { %v860_v26 = vmax.f32 %v704_v20, 0.0  ;;  %v707_v27 = vadd.f32 %v1691_v3, %v706_v24  ;;  %v708_v28 = vpop.f32.mrb[31].mxu0  ;;  %v886_v29 = vmax.f32 %v808_v22, 0.0  ;;  %v811_v30 = vadd.f32 %v1691_v3, %v810_v25  ;;  %v812_v31 = vpop.f32.mrb[31].mxu1 }
 0x156   : > { %v1345_v32 = vpack.c.bf16 %v860_v26, %v860_v26  ;;  %v861_v33 = vmax.f32 %v707_v27, 0.0  ;;  %v1371_v34 = vpack.c.bf16 %v886_v29, %v886_v29  ;;  %v887_v35 = vmax.f32 %v811_v30, 0.0 }
 0x158   : > { %1111 = vst.msk [vmem:[%s1701_s16 + $0x38] sm:$0xf] %vm1096_vm0, %v1345_v32  ;;  %v1346_v36 = vpack.c.bf16 %v861_v33, %v861_v33  ;;  %1137 = vst.msk [vmem:[%s1701_s16 + $0xa0] sm:$0xf] %vm1096_vm0, %v1371_v34  ;;  %v1372_v37 = vpack.c.bf16 %v887_v35, %v887_v35 }
 0x159   : > { %v711_v38 = vpop.f32.mrb[32].mxu0  ;;  %v815_v39 = vpop.f32.mrb[32].mxu1 }
 0x15a   : > { %1112 = vst.msk [vmem:[%s1701_s16 + $0x3c] sm:$0xf] %vm1096_vm0, %v1346_v36  ;;  %1138 = vst.msk [vmem:[%s1701_s16 + $0xa4] sm:$0xf] %vm1096_vm0, %v1372_v37  ;;  %v712_v40 = vadd.f32 %v1691_v3, %v711_v38  ;;  %v713_v41 = vpop.f32.mrb[33].mxu0  ;;  %v816_v42 = vadd.f32 %v1691_v3, %v815_v39  ;;  %v817_v43 = vpop.f32.mrb[33].mxu1 }
 0x15b   : > { %v714_v44 = vpop.f32.mrb[34].mxu0  ;;  %v818_v45 = vpop.f32.mrb[34].mxu1 }
 0x15c   : > { %v862_v46 = vmax.f32 %v712_v40, 0.0  ;;  %v715_v47 = vadd.f32 %v1691_v3, %v714_v44  ;;  %v716_v48 = vpop.f32.mrb[35].mxu0  ;;  %v888_v49 = vmax.f32 %v816_v42, 0.0  ;;  %v819_v50 = vadd.f32 %v1691_v3, %v818_v45  ;;  %v820_v51 = vpop.f32.mrb[35].mxu1 }
 0x15e   : > { %v1347_v52 = vpack.c.bf16 %v862_v46, %v862_v46  ;;  %v863_v53 = vmax.f32 %v715_v47, 0.0  ;;  %v1373_v54 = vpack.c.bf16 %v888_v49, %v888_v49  ;;  %v889_v55 = vmax.f32 %v819_v50, 0.0 }
 0x160   : > { %1113 = vst.msk [vmem:[%s1701_s16 + $0x40] sm:$0xf] %vm1096_vm0, %v1347_v52  ;;  %v1348_v56 = vpack.c.bf16 %v863_v53, %v863_v53  ;;  %1139 = vst.msk [vmem:[%s1701_s16 + $0xa8] sm:$0xf] %vm1096_vm0, %v1373_v54  ;;  %v1374_v57 = vpack.c.bf16 %v889_v55, %v889_v55 }
 0x161   : > { %v719_v58 = vpop.f32.mrb[36].mxu0  ;;  %v823_v59 = vpop.f32.mrb[36].mxu1 }
 0x162   : > { %1114 = vst.msk [vmem:[%s1701_s16 + $0x44] sm:$0xf] %vm1096_vm0, %v1348_v56  ;;  %1140 = vst.msk [vmem:[%s1701_s16 + $0xac] sm:$0xf] %vm1096_vm0, %v1374_v57  ;;  %v720_v60 = vadd.f32 %v1691_v3, %v719_v58  ;;  %v721_v61 = vpop.f32.mrb[37].mxu0  ;;  %v824_v62 = vadd.f32 %v1691_v3, %v823_v59  ;;  %v825_v63 = vpop.f32.mrb[37].mxu1 }
 0x163   : > { %v722_v0 = vpop.f32.mrb[38].mxu0  ;;  %v826_v1 = vpop.f32.mrb[38].mxu1 }
 0x164   : > { %v864_v2 = vmax.f32 %v720_v60, 0.0  ;;  %v723_v4 = vadd.f32 %v1691_v3, %v722_v0  ;;  %v724_v5 = vpop.f32.mrb[39].mxu0  ;;  %v890_v6 = vmax.f32 %v824_v62, 0.0  ;;  %v827_v7 = vadd.f32 %v1691_v3, %v826_v1  ;;  %v828_v8 = vpop.f32.mrb[39].mxu1 }
 0x166   : > { %v1349_v9 = vpack.c.bf16 %v864_v2, %v864_v2  ;;  %v865_v10 = vmax.f32 %v723_v4, 0.0  ;;  %v1375_v11 = vpack.c.bf16 %v890_v6, %v890_v6  ;;  %v891_v12 = vmax.f32 %v827_v7, 0.0 }
 0x168   : > { %1115 = vst.msk [vmem:[%s1701_s16 + $0x48] sm:$0xf] %vm1096_vm0, %v1349_v9  ;;  %v1350_v13 = vpack.c.bf16 %v865_v10, %v865_v10  ;;  %1141 = vst.msk [vmem:[%s1701_s16 + $0xb0] sm:$0xf] %vm1096_vm0, %v1375_v11  ;;  %v1376_v14 = vpack.c.bf16 %v891_v12, %v891_v12 }
 0x169   : > { %v727_v15 = vpop.f32.mrb[40].mxu0  ;;  %v831_v16 = vpop.f32.mrb[40].mxu1 }
 0x16a   : > { %1116 = vst.msk [vmem:[%s1701_s16 + $0x4c] sm:$0xf] %vm1096_vm0, %v1350_v13  ;;  %1142 = vst.msk [vmem:[%s1701_s16 + $0xb4] sm:$0xf] %vm1096_vm0, %v1376_v14  ;;  %v728_v17 = vadd.f32 %v1691_v3, %v727_v15  ;;  %v729_v18 = vpop.f32.mrb[41].mxu0  ;;  %v832_v19 = vadd.f32 %v1691_v3, %v831_v16  ;;  %v833_v20 = vpop.f32.mrb[41].mxu1 }
 0x16b   : > { %v730_v21 = vpop.f32.mrb[42].mxu0  ;;  %v834_v22 = vpop.f32.mrb[42].mxu1 }
 0x16c   : > { %v866_v23 = vmax.f32 %v728_v17, 0.0  ;;  %v731_v24 = vadd.f32 %v1691_v3, %v730_v21  ;;  %v732_v25 = vpop.f32.mrb[43].mxu0  ;;  %v892_v26 = vmax.f32 %v832_v19, 0.0  ;;  %v835_v27 = vadd.f32 %v1691_v3, %v834_v22  ;;  %v836_v28 = vpop.f32.mrb[43].mxu1 }
 0x16e   : > { %v1351_v29 = vpack.c.bf16 %v866_v23, %v866_v23  ;;  %v867_v30 = vmax.f32 %v731_v24, 0.0  ;;  %v1377_v31 = vpack.c.bf16 %v892_v26, %v892_v26  ;;  %v893_v32 = vmax.f32 %v835_v27, 0.0 }
 0x170   : > { %1117 = vst.msk [vmem:[%s1701_s16 + $0x50] sm:$0xf] %vm1096_vm0, %v1351_v29  ;;  %v1352_v33 = vpack.c.bf16 %v867_v30, %v867_v30  ;;  %1143 = vst.msk [vmem:[%s1701_s16 + $0xb8] sm:$0xf] %vm1096_vm0, %v1377_v31  ;;  %v1378_v34 = vpack.c.bf16 %v893_v32, %v893_v32 }
 0x171   : > { %v735_v35 = vpop.f32.mrb[44].mxu0  ;;  %v839_v36 = vpop.f32.mrb[44].mxu1 }
 0x172   : > { %1118 = vst.msk [vmem:[%s1701_s16 + $0x54] sm:$0xf] %vm1096_vm0, %v1352_v33  ;;  %1144 = vst.msk [vmem:[%s1701_s16 + $0xbc] sm:$0xf] %vm1096_vm0, %v1378_v34  ;;  %v736_v37 = vadd.f32 %v1691_v3, %v735_v35  ;;  %v737_v38 = vpop.f32.mrb[45].mxu0  ;;  %v840_v39 = vadd.f32 %v1691_v3, %v839_v36  ;;  %v841_v40 = vpop.f32.mrb[45].mxu1 }
 0x173   : > { %v738_v41 = vpop.f32.mrb[46].mxu0  ;;  %v842_v42 = vpop.f32.mrb[46].mxu1 }
 0x174   : > { %v868_v43 = vmax.f32 %v736_v37, 0.0  ;;  %v739_v44 = vadd.f32 %v1691_v3, %v738_v41  ;;  %v740_v45 = vpop.f32.mrb[47].mxu0  ;;  %v894_v46 = vmax.f32 %v840_v39, 0.0  ;;  %v843_v47 = vadd.f32 %v1691_v3, %v842_v42  ;;  %v844_v48 = vpop.f32.mrb[47].mxu1 }
 0x176   : > { %v1353_v49 = vpack.c.bf16 %v868_v43, %v868_v43  ;;  %v869_v50 = vmax.f32 %v739_v44, 0.0  ;;  %v1379_v51 = vpack.c.bf16 %v894_v46, %v894_v46  ;;  %v895_v52 = vmax.f32 %v843_v47, 0.0 }
 0x178   : > { %1119 = vst.msk [vmem:[%s1701_s16 + $0x58] sm:$0xf] %vm1096_vm0, %v1353_v49  ;;  %v1354_v53 = vpack.c.bf16 %v869_v50, %v869_v50  ;;  %1145 = vst.msk [vmem:[%s1701_s16 + $0xc0] sm:$0xf] %vm1096_vm0, %v1379_v51  ;;  %v1380_v54 = vpack.c.bf16 %v895_v52, %v895_v52 }
 0x179   : > { %v743_v55 = vpop.f32.mrb[48].mxu0 }
 0x17a   : > { %1120 = vst.msk [vmem:[%s1701_s16 + $0x5c] sm:$0xf] %vm1096_vm0, %v1354_v53  ;;  %1146 = vst.msk [vmem:[%s1701_s16 + $0xc4] sm:$0xf] %vm1096_vm0, %v1380_v54  ;;  %v744_v56 = vadd.f32 %v1691_v3, %v743_v55  ;;  %v745_v57 = vpop.f32.mrb[49].mxu0 }
 0x17b   : > { %v746_v58 = vpop.f32.mrb[50].mxu0 }
 0x17c   : > { %v870_v59 = vmax.f32 %v744_v56, 0.0  ;;  %v747_v60 = vadd.f32 %v1691_v3, %v746_v58  ;;  %v748_v61 = vpop.f32.mrb[51].mxu0 }
 0x17e   : > { %v1355_v62 = vpack.c.bf16 %v870_v59, %v870_v59  ;;  %v871_v63 = vmax.f32 %v747_v60, 0.0 }
 0x180   : > { %1121 = vst.msk [vmem:[%s1701_s16 + $0x60] sm:$0xf] %vm1096_vm0, %v1355_v62  ;;  %v1356_v0 = vpack.c.bf16 %v871_v63, %v871_v63 }
 0x182   : > { %1122 = vst.msk [vmem:[%s1701_s16 + $0x64] sm:$0xf] %vm1096_vm0, %v1356_v0 }
 0x183 PF: > { %s13_s12 = sadd.s32 1, %s1519_s12  }
 0x184   : > { %p10_p4 = scmp.ge.s32.totalorder %s13_s12, 4  }
 0x186   :  { %12 = sbr.rel (!%p10_p4) target bundleno = 1 (0x1), region = 62 }

// kernel: cnn_2c2f_forward.4
= control target key start
LH: loop header
LB: loop body
LE: loop exit
PB: predicated region body
PF: predicated region fallthrough
CT: control target
= control target key end

     0   :  { %s784_s12 = smov 0   ;;  %s906_s0 = inlined_call_operand.vmem [shape: bf16[176,256], index: 0, kind: input, shape index: {}]   ;;  %s907_s1 = inlined_call_operand.vmem [shape: bf16[256,32], index: 1, kind: input, shape index: {}]   ;;  %s908_s2 = inlined_call_operand.vmem [shape: f32[1,32], index: 2, kind: input, shape index: {}]   ;;  %s909_s3 = inlined_call_operand.vmem [shape: bf16[176,32], index: 3, kind: output, shape index: {}]  }
   0x1 LB: > { %s585_s13 = sadd.s32 4294967295, %s762_s12   ;;  %p589_p0 = scmp.ge.s32.totalorder %s762_s12, 1  ;;  %s762_s12 = sphi %s784_s12, %s13_s12  }
   0x2   : > { %p139_p1 = scmp.lt.s32.totalorder %s762_s12, 3 }
   0x4   : > { %p140_p2 = pnand %p589_p0, %p139_p1 }
   0x5   : > { %v723_v0 = vld [vmem:[%s907_s1 + $0x40] sm:$0xff] (!%p140_p2)   ;;  %s164_s16 = smul.u32 (!%p140_p2), 11, %s585_s13  ;;  %v725_v2 = vld [vmem:[%s907_s1 + $0x48] sm:$0xff] (!%p140_p2)   ;;  %v727_v4 = vld [vmem:[%s907_s1 + $0x50] sm:$0xff] (!%p140_p2)   ;;  %vm517_vm0 = vcmask (!%p140_p2), 257024  }
   0x6   : > { %143 = sbr.rel (%p140_p2) target bundleno = 278 (0x116), region = 32  ;;  %v724_v1 = vld [vmem:[%s907_s1] sm:$0xff] (!%p140_p2)   ;;  %647 = vmatprep.subr.bf16.mxu0 (!%p140_p2), %v723_v0  ;;  %699 = vmatprep.subr.bf16.mxu1 (!%p140_p2), %v723_v0  ;;  %v726_v3 = vld [vmem:[%s907_s1 + $0x8] sm:$0xff] (!%p140_p2)   ;;  %v728_v5 = vld [vmem:[%s907_s1 + $0x10] sm:$0xff] (!%p140_p2)  }
   0x7   : > { %648 = vmatpush3.bf16.msra.mxu0 (!%p140_p2), %v724_v1  ;;  %707 = vmatpush3.bf16.msra.mxu1 (!%p140_p2), %v724_v1  ;;  %p165_p3 = scmp.lt.s32.totalorder (!%p140_p2), %s164_s16, 21  ;;  %v729_v6 = vld [vmem:[%s907_s1 + $0x58] sm:$0xff] (!%p140_p2)   ;;  %v731_v8 = vld [vmem:[%s907_s1 + $0x60] sm:$0xff] (!%p140_p2)   ;;  %v733_v10 = vld [vmem:[%s907_s1 + $0x68] sm:$0xff] (!%p140_p2)  }
   0x8   : > { %649 = vmatprep.subr.bf16.mxu0 (!%p140_p2), %v725_v2  ;;  %700 = vmatprep.subr.bf16.mxu1 (!%p140_p2), %v725_v2  ;;  %v730_v7 = vld [vmem:[%s907_s1 + $0x18] sm:$0xff] (!%p140_p2)   ;;  %v732_v9 = vld [vmem:[%s907_s1 + $0x20] sm:$0xff] (!%p140_p2)   ;;  %v734_v13 = vld [vmem:[%s907_s1 + $0x28] sm:$0xff] (!%p140_p2)  }
   0x9   : > { %v735_v14 = vld [vmem:[%s907_s1 + $0x70] sm:$0xff] (!%p140_p2)   ;;  %v737_v16 = vld [vmem:[%s907_s1 + $0x78] sm:$0xff] (!%p140_p2)   ;;  %v862_v31 = vld [vmem:[%s908_s2] ss:$0 sm:$0xff] (!%p140_p2) }
   0xa   : > { %v736_v15 = vld [vmem:[%s907_s1 + $0x30] sm:$0xff] (!%p140_p2)   ;;  %v738_v17 = vld [vmem:[%s907_s1 + $0x38] sm:$0xff] (!%p140_p2)  }
   0xb   : > { %650 = vmatpush3.bf16.msra.mxu0 (!%p140_p2), %v726_v3  ;;  %708 = vmatpush3.bf16.msra.mxu1 (!%p140_p2), %v726_v3 }
   0xc   : > { %651 = vmatprep.subr.bf16.mxu0 (!%p140_p2), %v727_v4  ;;  %701 = vmatprep.subr.bf16.mxu1 (!%p140_p2), %v727_v4 }
   0xd   : > { %s911_s16 = smov (!%p165_p3, %s164_s16), 21 }
   0xe   : > { %s635_s4 = sshll.u32 %s911_s16, 3  ;;  %s592_s28 = sshll.u32 %s911_s16, 2 }
   0xf   : > { %652 = vmatpush3.bf16.msra.mxu0 %v728_v5  ;;  %709 = vmatpush3.bf16.msra.mxu1 %v728_v5  ;;  %s825_s9 = scalar_lea.vmem %s906_s0, %s635_s4  ;;  %s872_s4 = scalar_lea.vmem %s909_s3, %s592_s28 }
  0x10   : > { %653 = vmatprep.subr.bf16.mxu0 %v729_v6  ;;  %702 = vmatprep.subr.bf16.mxu1 %v729_v6  ;;  %v741_v11 = vld [vmem:[%s825_s9 + $0x4] ss:$8 sps:$4 sm:$0xff]   ;;  %v744_v12 = vld [vmem:[%s825_s9 + $0x34] ss:$8 sps:$4 sm:$0xff]   ;;  %v739_v18 = vld [vmem:[%s825_s9] ss:$8 sps:$4 sm:$0xff]  }
  0x11   : > { %413 = vmatprep.mubr.bf16.mxu0 %v741_v11  ;;  %437 = vmatprep.mubr.bf16.mxu1 %v744_v12  ;;  %v742_v19 = vld [vmem:[%s825_s9 + $0x30] ss:$8 sps:$4 sm:$0xff]   ;;  %v745_v20 = vld [vmem:[%s825_s9 + $0x14] ss:$8 sps:$4 sm:$0xff]   ;;  %v747_v21 = vld [vmem:[%s825_s9 + $0x44] ss:$8 sps:$4 sm:$0xff]  }
  0x12   : > { %v188_v22 = vld [vmem:[%s825_s9 + $0x50] sm:$0xff]  ;;  %v750_v24 = vld [vmem:[%s825_s9 + $0x40] ss:$8 sps:$4 sm:$0xff]   ;;  %v751_v25 = vld [vmem:[%s825_s9 + $0x24] ss:$8 sps:$4 sm:$0xff]  }
  0x13   : > { %654 = vmatpush3.bf16.msra.mxu0 %v730_v7  ;;  %710 = vmatpush3.bf16.msra.mxu1 %v730_v7  ;;  %v749_v23 = vld [vmem:[%s825_s9 + $0x10] ss:$8 sps:$4 sm:$0xff]   ;;  %v605_v26 = vcombine.high %v188_v22, %v188_v22  ;;  %v754_v27 = vld [vmem:[%s825_s9 + $0x20] ss:$8 sps:$4 sm:$0xff]   ;;  %v604_v28 = vcombine.low %v188_v22, %v188_v22 }
  0x14   : > { %655 = vmatprep.subr.bf16.mxu0 %v731_v8  ;;  %703 = vmatprep.subr.bf16.mxu1 %v731_v8 }
  0x17   : > { %656 = vmatpush3.bf16.msra.mxu0 %v732_v9  ;;  %711 = vmatpush3.bf16.msra.mxu1 %v732_v9 }
  0x18   : > { %657 = vmatprep.subr.bf16.mxu0 %v733_v10  ;;  %704 = vmatprep.subr.bf16.mxu1 %v733_v10 }
  0x1b   : > { %658 = vmatpush3.bf16.msra.mxu0 %v734_v13  ;;  %712 = vmatpush3.bf16.msra.mxu1 %v734_v13 }
  0x1c   : > { %659 = vmatprep.subr.bf16.mxu0 %v735_v14  ;;  %705 = vmatprep.subr.bf16.mxu1 %v735_v14 }
  0x1f   : > { %660 = vmatpush3.bf16.msra.mxu0 %v736_v15  ;;  %713 = vmatpush3.bf16.msra.mxu1 %v736_v15 }
  0x20   : > { %661 = vmatprep.subr.bf16.mxu0 %v737_v16  ;;  %706 = vmatprep.subr.bf16.mxu1 %v737_v16 }
  0x23   : > { %662 = vmatpush3.bf16.msra.mxu0 %v738_v17  ;;  %714 = vmatpush3.bf16.msra.mxu1 %v738_v17 }
  0x26   : > { %414 = vmatmul.mubr.bf16.vlgmr.msra.gmra.mrb[0].mxu0 %v739_v18  ;;  %438 = vmatmul.mubr.bf16.vlgmr.msra.gmra.mrb[0].mxu1 %v742_v19 }
  0x27   : > { %421 = vmatprep.mubr.bf16.mxu0 %v745_v20  ;;  %445 = vmatprep.mubr.bf16.mxu1 %v747_v21 }
  0x2e   : > { %422 = vmatmul.mubr.bf16.gmra.mrb[4].mxu0 %v749_v23  ;;  %446 = vmatmul.mubr.bf16.gmra.mrb[4].mxu1 %v750_v24 }
  0x2f   : > { %429 = vmatprep.mubr.bf16.mxu0 %v751_v25  ;;  %453 = vmatprep.mubr.bf16.mxu1 %v605_v26 }
  0x36   : > { %430 = vmatmul.mubr.bf16.gmra.mrb[8].mxu0 %v754_v27  ;;  %454 = vmatmul.mubr.bf16.gmra.mrb[8].mxu1 %v604_v28 }
  0xf9   : > { %v663_v29 = vpop.f32.mrb[0].mxu0  ;;  %v681_v30 = vpop.f32.mrb[0].mxu1 }
  0xfa   : > { %v664_v32 = vpop.f32.mrb[1].mxu0  ;;  %v682_v33 = vpop.f32.mrb[1].mxu1 }
  0xfb   : > { %v665_v34 = vadd.f32 %v664_v32, %v663_v29  ;;  %v683_v35 = vadd.f32 %v682_v33, %v681_v30  ;;  %v666_v36 = vpop.f32.mrb[2].mxu0  ;;  %v684_v37 = vpop.f32.mrb[2].mxu1 }
  0xfc   : > { %v667_v38 = vpop.f32.mrb[3].mxu0  ;;  %v685_v39 = vpop.f32.mrb[3].mxu1 }
  0xfd   : > { %v416_v40 = vadd.f32 %v665_v34, %v862_v31  ;;  %v440_v41 = vadd.f32 %v683_v35, %v862_v31  ;;  %v668_v42 = vadd.f32 %v667_v38, %v666_v36  ;;  %v686_v43 = vadd.f32 %v685_v39, %v684_v37 }
  0xff   : > { %v461_v44 = vmax.f32 %v416_v40, 0.0  ;;  %v467_v45 = vmax.f32 %v440_v41, 0.0  ;;  %v419_v46 = vadd.f32 %v668_v42, %v862_v31  ;;  %v443_v47 = vadd.f32 %v686_v43, %v862_v31 }
 0x101   : > { %v636_v48 = vpack.c.bf16 %v461_v44, %v461_v44  ;;  %v642_v49 = vpack.c.bf16 %v467_v45, %v467_v45  ;;  %v462_v50 = vmax.f32 %v419_v46, 0.0  ;;  %v468_v51 = vmax.f32 %v443_v47, 0.0  ;;  %v669_v52 = vpop.f32.mrb[4].mxu0  ;;  %v687_v53 = vpop.f32.mrb[4].mxu1 }
 0x102   : > { %v670_v54 = vpop.f32.mrb[5].mxu0  ;;  %v688_v55 = vpop.f32.mrb[5].mxu1 }
 0x103   : > { %518 = vst.msk [vmem:[%s872_s4] sm:$0xf] %vm517_vm0, %v636_v48  ;;  %524 = vst.msk [vmem:[%s872_s4 + $0x18] sm:$0xf] %vm517_vm0, %v642_v49  ;;  %v637_v56 = vpack.c.bf16 %v462_v50, %v462_v50  ;;  %v643_v57 = vpack.c.bf16 %v468_v51, %v468_v51  ;;  %v671_v58 = vadd.f32 %v670_v54, %v669_v52  ;;  %v672_v60 = vpop.f32.mrb[6].mxu0  ;;  %v690_v61 = vpop.f32.mrb[6].mxu1 }
 0x104   : > { %v689_v59 = vadd.f32 %v688_v55, %v687_v53  ;;  %v673_v62 = vpop.f32.mrb[7].mxu0  ;;  %v691_v63 = vpop.f32.mrb[7].mxu1 }
 0x105   : > { %519 = vst.msk [vmem:[%s872_s4 + $0x4] sm:$0xf] %vm517_vm0, %v637_v56  ;;  %525 = vst.msk [vmem:[%s872_s4 + $0x1c] sm:$0xf] %vm517_vm0, %v643_v57  ;;  %v424_v0 = vadd.f32 %v671_v58, %v862_v31  ;;  %v674_v2 = vadd.f32 %v673_v62, %v672_v60  ;;  %v692_v3 = vadd.f32 %v691_v63, %v690_v61 }
 0x106   : > { %v448_v1 = vadd.f32 %v689_v59, %v862_v31 }
 0x107   : > { %v463_v4 = vmax.f32 %v424_v0, 0.0  ;;  %v427_v6 = vadd.f32 %v674_v2, %v862_v31  ;;  %v451_v7 = vadd.f32 %v692_v3, %v862_v31 }
 0x108   : > { %v469_v5 = vmax.f32 %v448_v1, 0.0 }
 0x109   : > { %v638_v8 = vpack.c.bf16 %v463_v4, %v463_v4  ;;  %v464_v10 = vmax.f32 %v427_v6, 0.0  ;;  %v470_v11 = vmax.f32 %v451_v7, 0.0  ;;  %v675_v12 = vpop.f32.mrb[8].mxu0  ;;  %v693_v13 = vpop.f32.mrb[8].mxu1 }
 0x10a   : > { %v644_v9 = vpack.c.bf16 %v469_v5, %v469_v5  ;;  %v676_v14 = vpop.f32.mrb[9].mxu0  ;;  %v694_v15 = vpop.f32.mrb[9].mxu1 }
 0x10b   : > { %520 = vst.msk [vmem:[%s872_s4 + $0x8] sm:$0xf] %vm517_vm0, %v638_v8  ;;  %v639_v16 = vpack.c.bf16 %v464_v10, %v464_v10  ;;  %v645_v17 = vpack.c.bf16 %v470_v11, %v470_v11  ;;  %v677_v18 = vadd.f32 %v676_v14, %v675_v12  ;;  %v695_v19 = vadd.f32 %v694_v15, %v693_v13  ;;  %v678_v20 = vpop.f32.mrb[10].mxu0  ;;  %v696_v21 = vpop.f32.mrb[10].mxu1 }
 0x10c   : > { %526 = vst.msk [vmem:[%s872_s4 + $0x20] sm:$0xf] %vm517_vm0, %v644_v9  ;;  %v679_v22 = vpop.f32.mrb[11].mxu0  ;;  %v697_v23 = vpop.f32.mrb[11].mxu1 }
 0x10d   : > { %521 = vst.msk [vmem:[%s872_s4 + $0xc] sm:$0xf] %vm517_vm0, %v639_v16  ;;  %527 = vst.msk [vmem:[%s872_s4 + $0x24] sm:$0xf] %vm517_vm0, %v645_v17  ;;  %v432_v24 = vadd.f32 %v677_v18, %v862_v31  ;;  %v456_v25 = vadd.f32 %v695_v19, %v862_v31  ;;  %v680_v26 = vadd.f32 %v679_v22, %v678_v20 }
 0x10f   : > { %v465_v27 = vmax.f32 %v432_v24, 0.0  ;;  %v471_v28 = vmax.f32 %v456_v25, 0.0  ;;  %v435_v29 = vadd.f32 %v680_v26, %v862_v31 }
 0x111   : > { %v640_v30 = vpack.c.bf16 %v465_v27, %v465_v27  ;;  %v646_v32 = vpack.c.bf16 %v471_v28, %v471_v28  ;;  %v466_v33 = vmax.f32 %v435_v29, 0.0 }
 0x113   : > { %522 = vst.msk [vmem:[%s872_s4 + $0x10] sm:$0xf] %vm517_vm0, %v640_v30  ;;  %528 = vst.msk [vmem:[%s872_s4 + $0x28] sm:$0xf] %vm517_vm0, %v646_v32  ;;  %v641_v34 = vpack.c.bf16 %v466_v33, %v466_v33 }
 0x115   : > { %523 = vst.msk [vmem:[%s872_s4 + $0x14] sm:$0xf] %vm517_vm0, %v641_v34 }
 0x116 PF: > { %s13_s12 = sadd.s32 1, %s762_s12  }
 0x117   : > { %p10_p4 = scmp.ge.s32.totalorder %s13_s12, 4  }
 0x119   :  { %12 = sbr.rel (!%p10_p4) target bundleno = 1 (0x1), region = 62 }

// kernel: cnn_2c2f_forward.5
= control target key start
LH: loop header
LB: loop body
LE: loop exit
PB: predicated region body
PF: predicated region fallthrough
CT: control target
= control target key end

     0   :  { %v351_v38 = vlaneseq  ;;  %v3727_v39 = vmov 1966171168   ;;  %s4906_s0 = inlined_call_operand.vmem [shape: bf16[2,2592], index: 0, kind: input, shape index: {}]   ;;  %s4907_s1 = inlined_call_operand.vmem [shape: bf16[2592,256], index: 1, kind: input, shape index: {}]   ;;  %s4908_s2 = inlined_call_operand.vmem [shape: f32[1,256], index: 2, kind: input, shape index: {}]   ;;  %s4909_s3 = inlined_call_operand.vmem [shape: bf16[256,6], index: 3, kind: input, shape index: {}]   ;;  %s4910_s4 = inlined_call_operand.vmem [shape: f32[1,6], index: 4, kind: input, shape index: {}]   ;;  %s4911_s5 = inlined_call_operand.hbm [shape: f32[2,6], index: 5, kind: output, shape index: {}]  }
   0x1   :  { %v3198_v0 = vld [vmem:[%s4907_s1 + $0x4] ss:$8 sps:$4 sm:$0xff]   ;;  %v3202_v2 = vld [vmem:[%s4907_s1] ss:$8 sps:$4 sm:$0xff]   ;;  %v3204_v4 = vld [vmem:[%s4907_s1 + $0x14] ss:$8 sps:$4 sm:$0xff]   ;;  %v366_v40 = vunpack.c.l.s4 %v3727_v39 }
   0x2   :  { %v3200_v1 = vld [vmem:[%s4907_s1 + $0x504] ss:$8 sps:$4 sm:$0xff]   ;;  %2145 = vmatprep.subr.bf16.mxu1 %v3198_v0  ;;  %v3203_v3 = vld [vmem:[%s4907_s1 + $0x500] ss:$8 sps:$4 sm:$0xff]   ;;  %v3206_v5 = vld [vmem:[%s4907_s1 + $0x514] ss:$8 sps:$4 sm:$0xff]  }
   0x3   :  { %2350 = vmatprep.subr.bf16.mxu0 %v3200_v1  ;;  %2146 = vmatpush1.bf16.msra.mxu1 %v3202_v2  ;;  %v3208_v6 = vld [vmem:[%s4907_s1 + $0x10] ss:$8 sps:$4 sm:$0xff]   ;;  %v3210_v8 = vld [vmem:[%s4907_s1 + $0x24] ss:$8 sps:$4 sm:$0xff]   ;;  %v3214_v10 = vld [vmem:[%s4907_s1 + $0x20] ss:$8 sps:$4 sm:$0xff]   ;;  %v367_v46 = vunpack.c.0.s8 %v366_v40 }
   0x4   :  { %2351 = vmatpush1.bf16.msra.mxu0 %v3203_v3  ;;  %2147 = vmatprep.subr.bf16.mxu1 %v3204_v4  ;;  %v3209_v7 = vld [vmem:[%s4907_s1 + $0x510] ss:$8 sps:$4 sm:$0xff]   ;;  %v3212_v9 = vld [vmem:[%s4907_s1 + $0x524] ss:$8 sps:$4 sm:$0xff]   ;;  %v3215_v11 = vld [vmem:[%s4907_s1 + $0x520] ss:$8 sps:$4 sm:$0xff]  }
   0x5   :  { %2352 = vmatprep.subr.bf16.mxu0 %v3206_v5  ;;  %v3216_v12 = vld [vmem:[%s4907_s1 + $0x34] ss:$8 sps:$4 sm:$0xff]   ;;  %v3220_v14 = vld [vmem:[%s4907_s1 + $0x30] ss:$8 sps:$4 sm:$0xff]   ;;  %v3222_v16 = vld [vmem:[%s4907_s1 + $0x44] ss:$8 sps:$4 sm:$0xff]  }
   0x6   :  { %v3218_v13 = vld [vmem:[%s4907_s1 + $0x534] ss:$8 sps:$4 sm:$0xff]   ;;  %v3221_v15 = vld [vmem:[%s4907_s1 + $0x530] ss:$8 sps:$4 sm:$0xff]   ;;  %v3224_v17 = vld [vmem:[%s4907_s1 + $0x544] ss:$8 sps:$4 sm:$0xff]  }
   0x7   :  { %2148 = vmatpush1.bf16.msra.mxu1 %v3208_v6  ;;  %v3226_v18 = vld [vmem:[%s4907_s1 + $0x40] ss:$8 sps:$4 sm:$0xff]   ;;  %v3228_v20 = vld [vmem:[%s4907_s1 + $0x54] ss:$8 sps:$4 sm:$0xff]   ;;  %v3232_v22 = vld [vmem:[%s4907_s1 + $0x50] ss:$8 sps:$4 sm:$0xff]  }
   0x8   :  { %2353 = vmatpush1.bf16.msra.mxu0 %v3209_v7  ;;  %2149 = vmatprep.subr.bf16.mxu1 %v3210_v8  ;;  %v3227_v19 = vld [vmem:[%s4907_s1 + $0x540] ss:$8 sps:$4 sm:$0xff]   ;;  %v3230_v21 = vld [vmem:[%s4907_s1 + $0x554] ss:$8 sps:$4 sm:$0xff]   ;;  %v3233_v23 = vld [vmem:[%s4907_s1 + $0x550] ss:$8 sps:$4 sm:$0xff]  }
   0x9   :  { %2354 = vmatprep.subr.bf16.mxu0 %v3212_v9  ;;  %v3234_v24 = vld [vmem:[%s4907_s1 + $0x64] ss:$8 sps:$4 sm:$0xff]   ;;  %v3238_v26 = vld [vmem:[%s4907_s1 + $0x60] ss:$8 sps:$4 sm:$0xff]   ;;  %v3240_v28 = vld [vmem:[%s4907_s1 + $0x74] ss:$8 sps:$4 sm:$0xff]  }
   0xa   :  { %v3236_v25 = vld [vmem:[%s4907_s1 + $0x564] ss:$8 sps:$4 sm:$0xff]   ;;  %v3239_v27 = vld [vmem:[%s4907_s1 + $0x560] ss:$8 sps:$4 sm:$0xff]   ;;  %v3242_v29 = vld [vmem:[%s4907_s1 + $0x574] ss:$8 sps:$4 sm:$0xff]  }
   0xb   :  { %2150 = vmatpush1.bf16.msra.mxu1 %v3214_v10  ;;  %v3244_v30 = vld [vmem:[%s4907_s1 + $0x70] ss:$8 sps:$4 sm:$0xff]   ;;  %v3246_v32 = vld [vmem:[%s4907_s1 + $0x84] ss:$8 sps:$4 sm:$0xff]   ;;  %v3250_v34 = vld [vmem:[%s4907_s1 + $0x80] ss:$8 sps:$4 sm:$0xff]  }
   0xc   :  { %2355 = vmatpush1.bf16.msra.mxu0 %v3215_v11  ;;  %2151 = vmatprep.subr.bf16.mxu1 %v3216_v12  ;;  %v3245_v31 = vld [vmem:[%s4907_s1 + $0x570] ss:$8 sps:$4 sm:$0xff]   ;;  %v3248_v33 = vld [vmem:[%s4907_s1 + $0x584] ss:$8 sps:$4 sm:$0xff]   ;;  %v3251_v35 = vld [vmem:[%s4907_s1 + $0x580] ss:$8 sps:$4 sm:$0xff]  }
   0xd   :  { %2356 = vmatprep.subr.bf16.mxu0 %v3218_v13  ;;  %v3252_v36 = vld [vmem:[%s4907_s1 + $0x94] ss:$8 sps:$4 sm:$0xff]   ;;  %v3256_v41 = vld [vmem:[%s4907_s1 + $0x90] ss:$8 sps:$4 sm:$0xff]   ;;  %v3258_v43 = vld [vmem:[%s4907_s1 + $0xa4] ss:$8 sps:$4 sm:$0xff]  }
   0xe   :  { %v3254_v37 = vld [vmem:[%s4907_s1 + $0x594] ss:$8 sps:$4 sm:$0xff]   ;;  %v3257_v42 = vld [vmem:[%s4907_s1 + $0x590] ss:$8 sps:$4 sm:$0xff]   ;;  %v3260_v44 = vld [vmem:[%s4907_s1 + $0x5a4] ss:$8 sps:$4 sm:$0xff]  }
   0xf   :  { %2152 = vmatpush1.bf16.msra.mxu1 %v3220_v14  ;;  %v3886_v45 = vshrl.u32 %v351_v38, 7  ;;  %v3262_v47 = vld [vmem:[%s4907_s1 + $0xa0] ss:$8 sps:$4 sm:$0xff]   ;;  %v3264_v49 = vld [vmem:[%s4907_s1 + $0xb4] ss:$8 sps:$4 sm:$0xff]  }
  0x10   :  { %2357 = vmatpush1.bf16.msra.mxu0 %v3221_v15  ;;  %2153 = vmatprep.subr.bf16.mxu1 %v3222_v16  ;;  %v3263_v48 = vld [vmem:[%s4907_s1 + $0x5a0] ss:$8 sps:$4 sm:$0xff]   ;;  %v3266_v50 = vld [vmem:[%s4907_s1 + $0x5b4] ss:$8 sps:$4 sm:$0xff]   ;;  %v3268_v53 = vld [vmem:[%s4907_s1 + $0xb0] ss:$8 sps:$4 sm:$0xff]  }
  0x11   :  { %2358 = vmatprep.subr.bf16.mxu0 %v3224_v17  ;;  %v3901_v51 = vsub.s32 %v367_v46, %v3886_v45  ;;  %v3906_v52 = vld [vmem:[%s4906_s0] sm:$0xff]  ;;  %v3269_v55 = vld [vmem:[%s4907_s1 + $0x5b0] ss:$8 sps:$4 sm:$0xff]   ;;  %v23_v56 = vld [vmem:[%s4906_s0 + $0x8] sm:$0xff] }
  0x12   :  { %v3270_v57 = vld [vmem:[%s4907_s1 + $0xc4] ss:$8 sps:$4 sm:$0xff]   ;;  %v3274_v63 = vld [vmem:[%s4907_s1 + $0xc0] ss:$8 sps:$4 sm:$0xff]   ;;  %v3276_v1 = vld [vmem:[%s4907_s1 + $0xd4] ss:$8 sps:$4 sm:$0xff]   ;;  %v413_v9 = vcombine.high %v23_v56, %v23_v56 }
  0x13   :  { %2154 = vmatpush1.bf16.msra.mxu1 %v3226_v18  ;;  %v371_v54 = vrot.slane %v3906_v52, %v3901_v51  ;;  %v3272_v58 = vld [vmem:[%s4907_s1 + $0x5c4] ss:$8 sps:$4 sm:$0xff]   ;;  %v420_v60 = vrot.slane %v23_v56, %v3901_v51  ;;  %v3275_v0 = vld [vmem:[%s4907_s1 + $0x5c0] ss:$8 sps:$4 sm:$0xff]   ;;  %v3278_v2 = vld [vmem:[%s4907_s1 + $0x5d4] ss:$8 sps:$4 sm:$0xff]  }
  0x14   :  { %2359 = vmatpush1.bf16.msra.mxu0 %v3227_v19  ;;  %2155 = vmatprep.subr.bf16.mxu1 %v3228_v20  ;;  %v3280_v5 = vld [vmem:[%s4907_s1 + $0xd0] ss:$8 sps:$4 sm:$0xff]   ;;  %v3282_v7 = vld [vmem:[%s4907_s1 + $0xe4] ss:$8 sps:$4 sm:$0xff]   ;;  %v3286_v10 = vld [vmem:[%s4907_s1 + $0xe0] ss:$8 sps:$4 sm:$0xff]   ;;  %v3972_v14 = vrot.slane %v413_v9, %v3901_v51 }
  0x15   :  { %2360 = vmatprep.subr.bf16.mxu0 %v3230_v21  ;;  %v379_v59 = vcombine.high %v371_v54, %v371_v54  ;;  %v428_v62 = vcombine.high %v420_v60, %v420_v60  ;;  %v3281_v6 = vld [vmem:[%s4907_s1 + $0x5d0] ss:$8 sps:$4 sm:$0xff]   ;;  %v3284_v8 = vld [vmem:[%s4907_s1 + $0x5e4] ss:$8 sps:$4 sm:$0xff]   ;;  %v3287_v11 = vld [vmem:[%s4907_s1 + $0x5e0] ss:$8 sps:$4 sm:$0xff]   ;;  %v3975_v15 = vrot.slane %v420_v60, %v3901_v51  ;;  %v3992_v21 = vrot.slane %v371_v54, %v3901_v51 }
  0x16   :  { %v3288_v12 = vld [vmem:[%s4907_s1 + $0xf4] ss:$8 sps:$4 sm:$0xff]   ;;  %v3292_v16 = vld [vmem:[%s4907_s1 + $0xf0] ss:$8 sps:$4 sm:$0xff]   ;;  %v3297_v18 = vld [vmem:[%s4907_s1 + $0x104] ss:$8 sps:$4 sm:$0xff]   ;;  %v429_v20 = vcombine.high %v3972_v14, %v3972_v14 }
  0x17   :  { %2156 = vmatpush1.bf16.msra.mxu1 %v3232_v22  ;;  %v3927_v61 = vrot.slane %v379_v59, %v3901_v51  ;;  %v3942_v3 = vrot.slane %v428_v62, %v3901_v51  ;;  %v3290_v13 = vld [vmem:[%s4907_s1 + $0x5f4] ss:$8 sps:$4 sm:$0xff]   ;;  %v3293_v17 = vld [vmem:[%s4907_s1 + $0x5f0] ss:$8 sps:$4 sm:$0xff]   ;;  %v3301_v19 = vld [vmem:[%s4907_s1 + $0x604] ss:$8 sps:$4 sm:$0xff]   ;;  %v458_v22 = vcombine.high %v3975_v15, %v3975_v15 }
  0x18   :  { %2361 = vmatpush1.bf16.msra.mxu0 %v3233_v23  ;;  %2157 = vmatprep.subr.bf16.mxu1 %v3234_v24  ;;  %v3295_v23 = vld [vmem:[%s4907_s1 + $0x100] ss:$8 sps:$4 sm:$0xff]   ;;  %v3317_v38 = vld [vmem:[%s4907_s1 + $0x630] ss:$8 sps:$4 sm:$0xff]   ;;  %v3322_v39 = vld [vmem:[%s4907_s1 + $0x144] ss:$8 sps:$4 sm:$0xff]  }
  0x19   :  { %2362 = vmatprep.subr.bf16.mxu0 %v3236_v25  ;;  %2177 = vmatprep.mubr.bf16.mxu1 %v3927_v61  ;;  %v460_v4 = vcombine.high %v3942_v3, %v3942_v3  ;;  %v3299_v24 = vld [vmem:[%s4907_s1 + $0x600] ss:$8 sps:$4 sm:$0xff]   ;;  %v3304_v25 = vld [vmem:[%s4907_s1 + $0x114] ss:$8 sps:$4 sm:$0xff]   ;;  %v3325_v40 = vld [vmem:[%s4907_s1 + $0x644] ss:$8 sps:$4 sm:$0xff]  }
  0x1a   :  { %v3326_v46 = vld [vmem:[%s4907_s1 + $0x150] ss:$8 sps:$4 sm:$0xff]   ;;  %v3340_v54 = vld [vmem:[%s4907_s1 + $0x174] ss:$8 sps:$4 sm:$0xff]   ;;  %v3349_v59 = vld [vmem:[%s4907_s1 + $0x684] ss:$8 sps:$4 sm:$0xff]  }
  0x1b   :  { %2158 = vmatpush1.bf16.msra.mxu1 %v3238_v26  ;;  %2382 = vmatprep.mubr.bf16.mxu0 %v460_v4  ;;  %v3307_v26 = vld [vmem:[%s4907_s1 + $0x614] ss:$8 sps:$4 sm:$0xff]   ;;  %v3338_v56 = vld [vmem:[%s4907_s1 + $0x170] ss:$8 sps:$4 sm:$0xff]   ;;  %v3344_v60 = vld [vmem:[%s4907_s1 + $0x180] ss:$8 sps:$4 sm:$0xff]  }
  0x1c   :  { %2363 = vmatpush1.bf16.msra.mxu0 %v3239_v27  ;;  %2159 = vmatprep.subr.bf16.mxu1 %v3240_v28  ;;  %v411_v27 = vcombine.high %v3927_v61, %v3927_v61  ;;  %v4011_v28 = vrot.slane %v429_v20, %v3901_v51  ;;  %v3347_v61 = vld [vmem:[%s4907_s1 + $0x680] ss:$8 sps:$4 sm:$0xff]   ;;  %v3352_v62 = vld [vmem:[%s4907_s1 + $0x194] ss:$8 sps:$4 sm:$0xff]   ;;  %v3361_v4 = vld [vmem:[%s4907_s1 + $0x6a4] ss:$8 sps:$4 sm:$0xff]  }
  0x1d   :  { %2364 = vmatprep.subr.bf16.mxu0 %v3242_v29  ;;  %v3302_v29 = vld [vmem:[%s4907_s1 + $0x110] ss:$8 sps:$4 sm:$0xff]  }
  0x1e   :  { %v3362_v9 = vld [vmem:[%s4907_s1 + $0x1b0] ss:$8 sps:$4 sm:$0xff]  }
  0x1f   :  { %2160 = vmatpush1.bf16.msra.mxu1 %v3244_v30  ;;  %v3305_v30 = vld [vmem:[%s4907_s1 + $0x610] ss:$8 sps:$4 sm:$0xff]  }
  0x20   :  { %2365 = vmatpush1.bf16.msra.mxu0 %v3245_v31  ;;  %2161 = vmatprep.subr.bf16.mxu1 %v3246_v32  ;;  %v3310_v31 = vld [vmem:[%s4907_s1 + $0x124] ss:$8 sps:$4 sm:$0xff]   ;;  %v3377_v20 = vld [vmem:[%s4907_s1 + $0x6d0] ss:$8 sps:$4 sm:$0xff]  }
  0x21   :  { %2366 = vmatprep.subr.bf16.mxu0 %v3248_v33  ;;  %v3313_v32 = vld [vmem:[%s4907_s1 + $0x624] ss:$8 sps:$4 sm:$0xff]   ;;  %v3308_v33 = vld [vmem:[%s4907_s1 + $0x120] ss:$8 sps:$4 sm:$0xff]  }
  0x23   :  { %2162 = vmatpush1.bf16.msra.mxu1 %v3250_v34  ;;  %v3311_v34 = vld [vmem:[%s4907_s1 + $0x620] ss:$8 sps:$4 sm:$0xff]  }
  0x24   :  { %2367 = vmatpush1.bf16.msra.mxu0 %v3251_v35  ;;  %2163 = vmatprep.subr.bf16.mxu1 %v3252_v36  ;;  %v3316_v35 = vld [vmem:[%s4907_s1 + $0x134] ss:$8 sps:$4 sm:$0xff]  }
  0x25   :  { %2368 = vmatprep.subr.bf16.mxu0 %v3254_v37  ;;  %v3319_v36 = vld [vmem:[%s4907_s1 + $0x634] ss:$8 sps:$4 sm:$0xff]   ;;  %v3314_v37 = vld [vmem:[%s4907_s1 + $0x130] ss:$8 sps:$4 sm:$0xff]  }
  0x27   :  { %2164 = vmatpush1.bf16.msra.mxu1 %v3256_v41  ;;  %v3320_v41 = vld [vmem:[%s4907_s1 + $0x140] ss:$8 sps:$4 sm:$0xff]  }
  0x28   :  { %2369 = vmatpush1.bf16.msra.mxu0 %v3257_v42  ;;  %2165 = vmatprep.subr.bf16.mxu1 %v3258_v43  ;;  %v3323_v42 = vld [vmem:[%s4907_s1 + $0x640] ss:$8 sps:$4 sm:$0xff]   ;;  %v3328_v43 = vld [vmem:[%s4907_s1 + $0x154] ss:$8 sps:$4 sm:$0xff]  }
  0x29   :  { %2370 = vmatprep.subr.bf16.mxu0 %v3260_v44  ;;  %v3331_v44 = vld [vmem:[%s4907_s1 + $0x654] ss:$8 sps:$4 sm:$0xff]  }
  0x2b   :  { %2166 = vmatpush1.bf16.msra.mxu1 %v3262_v47  ;;  %v3329_v47 = vld [vmem:[%s4907_s1 + $0x650] ss:$8 sps:$4 sm:$0xff]  }
  0x2c   :  { %2371 = vmatpush1.bf16.msra.mxu0 %v3263_v48  ;;  %2167 = vmatprep.subr.bf16.mxu1 %v3264_v49  ;;  %v3334_v48 = vld [vmem:[%s4907_s1 + $0x164] ss:$8 sps:$4 sm:$0xff]  }
  0x2d   :  { %2372 = vmatprep.subr.bf16.mxu0 %v3266_v50  ;;  %v3337_v49 = vld [vmem:[%s4907_s1 + $0x664] ss:$8 sps:$4 sm:$0xff]   ;;  %v3332_v50 = vld [vmem:[%s4907_s1 + $0x160] ss:$8 sps:$4 sm:$0xff]  }
  0x2f   :  { %2168 = vmatpush1.bf16.msra.mxu1 %v3268_v53  ;;  %v3335_v53 = vld [vmem:[%s4907_s1 + $0x660] ss:$8 sps:$4 sm:$0xff]  }
  0x30   :  { %2373 = vmatpush1.bf16.msra.mxu0 %v3269_v55  ;;  %2169 = vmatprep.subr.bf16.mxu1 %v3270_v57  ;;  %v3343_v55 = vld [vmem:[%s4907_s1 + $0x674] ss:$8 sps:$4 sm:$0xff]   ;;  %v3341_v57 = vld [vmem:[%s4907_s1 + $0x670] ss:$8 sps:$4 sm:$0xff]  }
  0x31   :  { %2374 = vmatprep.subr.bf16.mxu0 %v3272_v58  ;;  %v3346_v58 = vld [vmem:[%s4907_s1 + $0x184] ss:$8 sps:$4 sm:$0xff]  }
  0x33   :  { %2170 = vmatpush1.bf16.msra.mxu1 %v3274_v63  ;;  %v3355_v63 = vld [vmem:[%s4907_s1 + $0x694] ss:$8 sps:$4 sm:$0xff]  }
  0x34   :  { %2375 = vmatpush1.bf16.msra.mxu0 %v3275_v0  ;;  %2171 = vmatprep.subr.bf16.mxu1 %v3276_v1  ;;  %v3350_v0 = vld [vmem:[%s4907_s1 + $0x190] ss:$8 sps:$4 sm:$0xff]  }
  0x35   :  { %2376 = vmatprep.subr.bf16.mxu0 %v3278_v2  ;;  %v3353_v1 = vld [vmem:[%s4907_s1 + $0x690] ss:$8 sps:$4 sm:$0xff]   ;;  %v3358_v2 = vld [vmem:[%s4907_s1 + $0x1a4] ss:$8 sps:$4 sm:$0xff]  }
  0x37   :  { %2172 = vmatpush1.bf16.msra.mxu1 %v3280_v5  ;;  %v3356_v5 = vld [vmem:[%s4907_s1 + $0x1a0] ss:$8 sps:$4 sm:$0xff]  }
  0x38   :  { %2377 = vmatpush1.bf16.msra.mxu0 %v3281_v6  ;;  %2173 = vmatprep.subr.bf16.mxu1 %v3282_v7  ;;  %v3359_v6 = vld [vmem:[%s4907_s1 + $0x6a0] ss:$8 sps:$4 sm:$0xff]   ;;  %v3364_v7 = vld [vmem:[%s4907_s1 + $0x1b4] ss:$8 sps:$4 sm:$0xff]  }
  0x39   :  { %2378 = vmatprep.subr.bf16.mxu0 %v3284_v8  ;;  %v3367_v8 = vld [vmem:[%s4907_s1 + $0x6b4] ss:$8 sps:$4 sm:$0xff]  }
  0x3b   :  { %2174 = vmatpush1.bf16.msra.mxu1 %v3286_v10  ;;  %v3365_v10 = vld [vmem:[%s4907_s1 + $0x6b0] ss:$8 sps:$4 sm:$0xff]  }
  0x3c   :  { %2379 = vmatpush1.bf16.msra.mxu0 %v3287_v11  ;;  %2175 = vmatprep.subr.bf16.mxu1 %v3288_v12  ;;  %v3370_v11 = vld [vmem:[%s4907_s1 + $0x1c4] ss:$8 sps:$4 sm:$0xff]  }
  0x3d   :  { %2380 = vmatprep.subr.bf16.mxu0 %v3290_v13  ;;  %v3373_v12 = vld [vmem:[%s4907_s1 + $0x6c4] ss:$8 sps:$4 sm:$0xff]   ;;  %v3368_v13 = vld [vmem:[%s4907_s1 + $0x1c0] ss:$8 sps:$4 sm:$0xff]  }
  0x3f   :  { %2176 = vmatpush1.bf16.msra.mxu1 %v3292_v16  ;;  %v3371_v16 = vld [vmem:[%s4907_s1 + $0x6c0] ss:$8 sps:$4 sm:$0xff]  }
  0x40   :  { %2381 = vmatpush1.bf16.msra.mxu0 %v3293_v17  ;;  %2186 = vmatprep.subr.bf16.mxu1 %v3297_v18  ;;  %v3376_v17 = vld [vmem:[%s4907_s1 + $0x1d4] ss:$8 sps:$4 sm:$0xff]  }
  0x41   :  { %2391 = vmatprep.subr.bf16.mxu0 %v3301_v19  ;;  %v3379_v18 = vld [vmem:[%s4907_s1 + $0x6d4] ss:$8 sps:$4 sm:$0xff]   ;;  %v3374_v19 = vld [vmem:[%s4907_s1 + $0x1d0] ss:$8 sps:$4 sm:$0xff]  }
  0x42   :  { %2178 = vmatmul.mubr.bf16.vlgmr.msra.gmra.mrb[0].mxu1 %v3992_v21 }
  0x43   :  { %2383 = vmatmul.mubr.bf16.vlgmr.msra.gmra.mrb[0].mxu0 %v458_v22  ;;  %2187 = vmatpush1.bf16.msra.mxu1 %v3295_v23  ;;  %v3382_v22 = vld [vmem:[%s4907_s1 + $0x1e4] ss:$8 sps:$4 sm:$0xff]  }
  0x44   :  { %2392 = vmatpush1.bf16.msra.mxu0 %v3299_v24  ;;  %2188 = vmatprep.subr.bf16.mxu1 %v3304_v25  ;;  %v3385_v23 = vld [vmem:[%s4907_s1 + $0x6e4] ss:$8 sps:$4 sm:$0xff]   ;;  %v364_v24 = vcombine.high %v3906_v52, %v3906_v52  ;;  %v3380_v25 = vld [vmem:[%s4907_s1 + $0x1e0] ss:$8 sps:$4 sm:$0xff]   ;;  %v3391_v52 = vld [vmem:[%s4907_s1 + $0x6f4] ss:$8 sps:$4 sm:$0xff]  }
  0x45   :  { %2393 = vmatprep.subr.bf16.mxu0 %v3307_v26  ;;  %2218 = vmatprep.mubr.bf16.mxu1 %v411_v27  ;;  %v3383_v26 = vld [vmem:[%s4907_s1 + $0x6e0] ss:$8 sps:$4 sm:$0xff]   ;;  %v3388_v27 = vld [vmem:[%s4907_s1 + $0x1f4] ss:$8 sps:$4 sm:$0xff]  }
  0x46   :  { %2423 = vmatprep.mubr.bf16.mxu0 %v4011_v28 }
  0x47   :  { %2189 = vmatpush1.bf16.msra.mxu1 %v3302_v29  ;;  %v4186_v29 = vrot.slane %v364_v24, %v3901_v51  ;;  %v3461_v24 = vld [vmem:[%s4907_s1 + $0x7b0] ss:$8 sps:$4 sm:$0xff]  }
  0x48   :  { %2394 = vmatpush1.bf16.msra.mxu0 %v3305_v30  ;;  %2190 = vmatprep.subr.bf16.mxu1 %v3310_v31  ;;  %v3386_v30 = vld [vmem:[%s4907_s1 + $0x1f0] ss:$8 sps:$4 sm:$0xff]  }
  0x49   :  { %2395 = vmatprep.subr.bf16.mxu0 %v3313_v32  ;;  %v3389_v31 = vld [vmem:[%s4907_s1 + $0x6f0] ss:$8 sps:$4 sm:$0xff]   ;;  %v3394_v32 = vld [vmem:[%s4907_s1 + $0x204] ss:$8 sps:$4 sm:$0xff]  }
  0x4b   :  { %2191 = vmatpush1.bf16.msra.mxu1 %v3308_v33  ;;  %v3397_v33 = vld [vmem:[%s4907_s1 + $0x704] ss:$8 sps:$4 sm:$0xff]  }
  0x4c   :  { %2396 = vmatpush1.bf16.msra.mxu0 %v3311_v34  ;;  %2192 = vmatprep.subr.bf16.mxu1 %v3316_v35  ;;  %v380_v34 = vcombine.high %v4186_v29, %v4186_v29  ;;  %v409_v35 = vcombine.high %v3992_v21, %v3992_v21  ;;  %v3400_v21 = vld [vmem:[%s4907_s1 + $0x214] ss:$8 sps:$4 sm:$0xff]  }
  0x4d   :  { %2397 = vmatprep.subr.bf16.mxu0 %v3319_v36  ;;  %v4206_v36 = vrot.slane %v3972_v14, %v3901_v51  ;;  %v3403_v14 = vld [vmem:[%s4907_s1 + $0x714] ss:$8 sps:$4 sm:$0xff]  }
  0x4f   :  { %2193 = vmatpush1.bf16.msra.mxu1 %v3314_v37  ;;  %v3392_v37 = vld [vmem:[%s4907_s1 + $0x200] ss:$8 sps:$4 sm:$0xff]  }
  0x50   :  { %2398 = vmatpush1.bf16.msra.mxu0 %v3317_v38  ;;  %2194 = vmatprep.subr.bf16.mxu1 %v3322_v39  ;;  %v3395_v38 = vld [vmem:[%s4907_s1 + $0x700] ss:$8 sps:$4 sm:$0xff]   ;;  %v4221_v39 = vrot.slane %v380_v34, %v3901_v51  ;;  %v3478_v34 = vld [vmem:[%s4907_s1 + $0x2e4] ss:$8 sps:$4 sm:$0xff]  }
  0x51   :  { %2399 = vmatprep.subr.bf16.mxu0 %v3325_v40  ;;  %v461_v40 = vcombine.high %v4011_v28, %v4011_v28  ;;  %v3409_v28 = vld [vmem:[%s4907_s1 + $0x724] ss:$8 sps:$4 sm:$0xff]  }
  0x53   :  { %2195 = vmatpush1.bf16.msra.mxu1 %v3320_v41  ;;  %v3398_v41 = vld [vmem:[%s4907_s1 + $0x210] ss:$8 sps:$4 sm:$0xff]  }
  0x54   :  { %2400 = vmatpush1.bf16.msra.mxu0 %v3323_v42  ;;  %2196 = vmatprep.subr.bf16.mxu1 %v3328_v43  ;;  %v3401_v42 = vld [vmem:[%s4907_s1 + $0x710] ss:$8 sps:$4 sm:$0xff]   ;;  %v3406_v43 = vld [vmem:[%s4907_s1 + $0x224] ss:$8 sps:$4 sm:$0xff]  }
  0x55   :  { %2401 = vmatprep.subr.bf16.mxu0 %v3331_v44  ;;  %v3404_v44 = vld [vmem:[%s4907_s1 + $0x220] ss:$8 sps:$4 sm:$0xff]  }
  0x57   :  { %2197 = vmatpush1.bf16.msra.mxu1 %v3326_v46  ;;  %v3407_v46 = vld [vmem:[%s4907_s1 + $0x720] ss:$8 sps:$4 sm:$0xff]  }
  0x58   :  { %2402 = vmatpush1.bf16.msra.mxu0 %v3329_v47  ;;  %2198 = vmatprep.subr.bf16.mxu1 %v3334_v48  ;;  %v3412_v47 = vld [vmem:[%s4907_s1 + $0x234] ss:$8 sps:$4 sm:$0xff]  }
  0x59   :  { %2403 = vmatprep.subr.bf16.mxu0 %v3337_v49  ;;  %v3415_v48 = vld [vmem:[%s4907_s1 + $0x734] ss:$8 sps:$4 sm:$0xff]   ;;  %v3410_v49 = vld [vmem:[%s4907_s1 + $0x230] ss:$8 sps:$4 sm:$0xff]  }
  0x5b   :  { %2199 = vmatpush1.bf16.msra.mxu1 %v3332_v50  ;;  %v3413_v50 = vld [vmem:[%s4907_s1 + $0x730] ss:$8 sps:$4 sm:$0xff]  }
  0x5c   :  { %2404 = vmatpush1.bf16.msra.mxu0 %v3335_v53  ;;  %2200 = vmatprep.subr.bf16.mxu1 %v3340_v54  ;;  %v3418_v53 = vld [vmem:[%s4907_s1 + $0x244] ss:$8 sps:$4 sm:$0xff]  }
  0x5d   :  { %2405 = vmatprep.subr.bf16.mxu0 %v3343_v55  ;;  %v3421_v54 = vld [vmem:[%s4907_s1 + $0x744] ss:$8 sps:$4 sm:$0xff]   ;;  %v3416_v55 = vld [vmem:[%s4907_s1 + $0x240] ss:$8 sps:$4 sm:$0xff]  }
  0x5f   :  { %2201 = vmatpush1.bf16.msra.mxu1 %v3338_v56  ;;  %v3419_v56 = vld [vmem:[%s4907_s1 + $0x740] ss:$8 sps:$4 sm:$0xff]  }
  0x60   :  { %2406 = vmatpush1.bf16.msra.mxu0 %v3341_v57  ;;  %2202 = vmatprep.subr.bf16.mxu1 %v3346_v58  ;;  %v3424_v57 = vld [vmem:[%s4907_s1 + $0x254] ss:$8 sps:$4 sm:$0xff]  }
  0x61   :  { %2407 = vmatprep.subr.bf16.mxu0 %v3349_v59  ;;  %v3427_v58 = vld [vmem:[%s4907_s1 + $0x754] ss:$8 sps:$4 sm:$0xff]   ;;  %v3422_v59 = vld [vmem:[%s4907_s1 + $0x250] ss:$8 sps:$4 sm:$0xff]  }
  0x63   :  { %2203 = vmatpush1.bf16.msra.mxu1 %v3344_v60  ;;  %v3425_v60 = vld [vmem:[%s4907_s1 + $0x750] ss:$8 sps:$4 sm:$0xff]  }
  0x64   :  { %2408 = vmatpush1.bf16.msra.mxu0 %v3347_v61  ;;  %2204 = vmatprep.subr.bf16.mxu1 %v3352_v62  ;;  %v3430_v61 = vld [vmem:[%s4907_s1 + $0x264] ss:$8 sps:$4 sm:$0xff]  }
  0x65   :  { %2409 = vmatprep.subr.bf16.mxu0 %v3355_v63  ;;  %v3433_v62 = vld [vmem:[%s4907_s1 + $0x764] ss:$8 sps:$4 sm:$0xff]   ;;  %v3428_v63 = vld [vmem:[%s4907_s1 + $0x260] ss:$8 sps:$4 sm:$0xff]  }
  0x67   :  { %2205 = vmatpush1.bf16.msra.mxu1 %v3350_v0  ;;  %v3431_v0 = vld [vmem:[%s4907_s1 + $0x760] ss:$8 sps:$4 sm:$0xff]  }
  0x68   :  { %2410 = vmatpush1.bf16.msra.mxu0 %v3353_v1  ;;  %2206 = vmatprep.subr.bf16.mxu1 %v3358_v2  ;;  %v3436_v1 = vld [vmem:[%s4907_s1 + $0x274] ss:$8 sps:$4 sm:$0xff]  }
  0x69   :  { %2411 = vmatprep.subr.bf16.mxu0 %v3361_v4  ;;  %v3439_v2 = vld [vmem:[%s4907_s1 + $0x774] ss:$8 sps:$4 sm:$0xff]   ;;  %v3434_v4 = vld [vmem:[%s4907_s1 + $0x270] ss:$8 sps:$4 sm:$0xff]  }
  0x6b   :  { %2207 = vmatpush1.bf16.msra.mxu1 %v3356_v5  ;;  %v3437_v5 = vld [vmem:[%s4907_s1 + $0x770] ss:$8 sps:$4 sm:$0xff]  }
  0x6c   :  { %2412 = vmatpush1.bf16.msra.mxu0 %v3359_v6  ;;  %2208 = vmatprep.subr.bf16.mxu1 %v3364_v7  ;;  %v3442_v6 = vld [vmem:[%s4907_s1 + $0x284] ss:$8 sps:$4 sm:$0xff]  }
  0x6d   :  { %2413 = vmatprep.subr.bf16.mxu0 %v3367_v8  ;;  %v3445_v7 = vld [vmem:[%s4907_s1 + $0x784] ss:$8 sps:$4 sm:$0xff]   ;;  %v3440_v8 = vld [vmem:[%s4907_s1 + $0x280] ss:$8 sps:$4 sm:$0xff]  }
  0x6f   :  { %2209 = vmatpush1.bf16.msra.mxu1 %v3362_v9  ;;  %v3443_v9 = vld [vmem:[%s4907_s1 + $0x780] ss:$8 sps:$4 sm:$0xff]  }
  0x70   :  { %2414 = vmatpush1.bf16.msra.mxu0 %v3365_v10  ;;  %2210 = vmatprep.subr.bf16.mxu1 %v3370_v11  ;;  %v3448_v10 = vld [vmem:[%s4907_s1 + $0x294] ss:$8 sps:$4 sm:$0xff]  }
  0x71   :  { %2415 = vmatprep.subr.bf16.mxu0 %v3373_v12  ;;  %v3451_v11 = vld [vmem:[%s4907_s1 + $0x794] ss:$8 sps:$4 sm:$0xff]   ;;  %v3446_v12 = vld [vmem:[%s4907_s1 + $0x290] ss:$8 sps:$4 sm:$0xff]  }
  0x73   :  { %2211 = vmatpush1.bf16.msra.mxu1 %v3368_v13  ;;  %v3449_v13 = vld [vmem:[%s4907_s1 + $0x790] ss:$8 sps:$4 sm:$0xff]  }
  0x74   :  { %2416 = vmatpush1.bf16.msra.mxu0 %v3371_v16  ;;  %2212 = vmatprep.subr.bf16.mxu1 %v3376_v17  ;;  %v3454_v16 = vld [vmem:[%s4907_s1 + $0x2a4] ss:$8 sps:$4 sm:$0xff]  }
  0x75   :  { %2417 = vmatprep.subr.bf16.mxu0 %v3379_v18  ;;  %v3457_v17 = vld [vmem:[%s4907_s1 + $0x7a4] ss:$8 sps:$4 sm:$0xff]   ;;  %v3452_v18 = vld [vmem:[%s4907_s1 + $0x2a0] ss:$8 sps:$4 sm:$0xff]  }
  0x77   :  { %2213 = vmatpush1.bf16.msra.mxu1 %v3374_v19  ;;  %v3455_v19 = vld [vmem:[%s4907_s1 + $0x7a0] ss:$8 sps:$4 sm:$0xff]  }
  0x78   :  { %2418 = vmatpush1.bf16.msra.mxu0 %v3377_v20  ;;  %2214 = vmatprep.subr.bf16.mxu1 %v3382_v22  ;;  %v3460_v20 = vld [vmem:[%s4907_s1 + $0x2b4] ss:$8 sps:$4 sm:$0xff]  }
  0x79   :  { %2419 = vmatprep.subr.bf16.mxu0 %v3385_v23  ;;  %v3463_v22 = vld [vmem:[%s4907_s1 + $0x7b4] ss:$8 sps:$4 sm:$0xff]   ;;  %v3458_v23 = vld [vmem:[%s4907_s1 + $0x2b0] ss:$8 sps:$4 sm:$0xff]  }
  0x7b   :  { %2215 = vmatpush1.bf16.msra.mxu1 %v3380_v25  ;;  %v3466_v25 = vld [vmem:[%s4907_s1 + $0x2c4] ss:$8 sps:$4 sm:$0xff]  }
  0x7c   :  { %2420 = vmatpush1.bf16.msra.mxu0 %v3383_v26  ;;  %2216 = vmatprep.subr.bf16.mxu1 %v3388_v27  ;;  %v3469_v26 = vld [vmem:[%s4907_s1 + $0x7c4] ss:$8 sps:$4 sm:$0xff]   ;;  %v3464_v27 = vld [vmem:[%s4907_s1 + $0x2c0] ss:$8 sps:$4 sm:$0xff]  }
  0x7d   :  { %2421 = vmatprep.subr.bf16.mxu0 %v3391_v52  ;;  %v3467_v52 = vld [vmem:[%s4907_s1 + $0x7c0] ss:$8 sps:$4 sm:$0xff]  }
  0x7f   :  { %2217 = vmatpush1.bf16.msra.mxu1 %v3386_v30  ;;  %v3472_v30 = vld [vmem:[%s4907_s1 + $0x2d4] ss:$8 sps:$4 sm:$0xff]  }
  0x80   :  { %2422 = vmatpush1.bf16.msra.mxu0 %v3389_v31  ;;  %2227 = vmatprep.subr.bf16.mxu1 %v3394_v32  ;;  %v3475_v31 = vld [vmem:[%s4907_s1 + $0x7d4] ss:$8 sps:$4 sm:$0xff]   ;;  %v3470_v32 = vld [vmem:[%s4907_s1 + $0x2d0] ss:$8 sps:$4 sm:$0xff]  }
  0x81   :  { %2432 = vmatprep.subr.bf16.mxu0 %v3397_v33  ;;  %v3473_v33 = vld [vmem:[%s4907_s1 + $0x7d0] ss:$8 sps:$4 sm:$0xff]  }
  0x82   :  { %2219 = vmatmul.mubr.bf16.vlgmr.msra.gmra.mrb[0].mxu1 %v409_v35  ;;  %v3481_v35 = vld [vmem:[%s4907_s1 + $0x7e4] ss:$8 sps:$4 sm:$0xff]  }
  0x83   :  { %2424 = vmatmul.mubr.bf16.vlgmr.msra.gmra.mrb[0].mxu0 %v4206_v36  ;;  %2228 = vmatpush1.bf16.msra.mxu1 %v3392_v37  ;;  %v3476_v37 = vld [vmem:[%s4907_s1 + $0x2e0] ss:$8 sps:$4 sm:$0xff]  }
  0x84   :  { %2433 = vmatpush1.bf16.msra.mxu0 %v3395_v38  ;;  %2229 = vmatprep.subr.bf16.mxu1 %v3400_v21  ;;  %v4389_v38 = vld [vmem:[%s4906_s0 + $0x10] sm:$0x1f]  ;;  %v3479_v21 = vld [vmem:[%s4907_s1 + $0x7e0] ss:$8 sps:$4 sm:$0xff]  }
  0x85   :  { %2434 = vmatprep.subr.bf16.mxu0 %v3403_v14  ;;  %2259 = vmatprep.mubr.bf16.mxu1 %v4221_v39  ;;  %v3484_v14 = vld [vmem:[%s4907_s1 + $0x2f4] ss:$8 sps:$4 sm:$0xff]  }
  0x86   :  { %2464 = vmatprep.mubr.bf16.mxu0 %v461_v40  ;;  %v3487_v40 = vld [vmem:[%s4907_s1 + $0x7f4] ss:$8 sps:$4 sm:$0xff]  }
  0x87   :  { %2230 = vmatpush1.bf16.msra.mxu1 %v3398_v41  ;;  %v4402_v41 = vrot.slane %v4389_v38, %v3901_v51 }
  0x88   :  { %2435 = vmatpush1.bf16.msra.mxu0 %v3401_v42  ;;  %2231 = vmatprep.subr.bf16.mxu1 %v3406_v43  ;;  %v3482_v42 = vld [vmem:[%s4907_s1 + $0x2f0] ss:$8 sps:$4 sm:$0xff]  }
  0x89   :  { %2436 = vmatprep.subr.bf16.mxu0 %v3409_v28  ;;  %v3485_v43 = vld [vmem:[%s4907_s1 + $0x7f0] ss:$8 sps:$4 sm:$0xff]   ;;  %v3490_v28 = vld [vmem:[%s4907_s1 + $0x304] ss:$8 sps:$4 sm:$0xff]  }
  0x8b   :  { %2232 = vmatpush1.bf16.msra.mxu1 %v3404_v44  ;;  %v3493_v44 = vld [vmem:[%s4907_s1 + $0x804] ss:$8 sps:$4 sm:$0xff]  }
  0x8c   :  { %2437 = vmatpush1.bf16.msra.mxu0 %v3407_v46  ;;  %2233 = vmatprep.subr.bf16.mxu1 %v3412_v47  ;;  %v477_v46 = vcombine.high %v4402_v41, %v4402_v41  ;;  %v3488_v47 = vld [vmem:[%s4907_s1 + $0x300] ss:$8 sps:$4 sm:$0xff]  }
  0x8d   :  { %2438 = vmatprep.subr.bf16.mxu0 %v3415_v48  ;;  %v4423_v48 = vrot.slane %v4186_v29, %v3901_v51  ;;  %v3499_v29 = vld [vmem:[%s4907_s1 + $0x814] ss:$8 sps:$4 sm:$0xff]  }
  0x8f   :  { %2234 = vmatpush1.bf16.msra.mxu1 %v3410_v49  ;;  %v459_v49 = vcombine.high %v4206_v36, %v4206_v36  ;;  %v4439_v36 = vrot.slane %v477_v46, %v3901_v51 }
  0x90   :  { %2439 = vmatpush1.bf16.msra.mxu0 %v3413_v50  ;;  %2235 = vmatprep.subr.bf16.mxu1 %v3418_v53  ;;  %v3491_v50 = vld [vmem:[%s4907_s1 + $0x800] ss:$8 sps:$4 sm:$0xff]   ;;  %v3496_v53 = vld [vmem:[%s4907_s1 + $0x314] ss:$8 sps:$4 sm:$0xff]  }
  0x91   :  { %2440 = vmatprep.subr.bf16.mxu0 %v3421_v54  ;;  %v412_v54 = vcombine.high %v4221_v39, %v4221_v39  ;;  %v3502_v39 = vld [vmem:[%s4907_s1 + $0x324] ss:$8 sps:$4 sm:$0xff]  }
  0x93   :  { %2236 = vmatpush1.bf16.msra.mxu1 %v3416_v55  ;;  %v3494_v55 = vld [vmem:[%s4907_s1 + $0x310] ss:$8 sps:$4 sm:$0xff]  }
  0x94   :  { %2441 = vmatpush1.bf16.msra.mxu0 %v3419_v56  ;;  %2237 = vmatprep.subr.bf16.mxu1 %v3424_v57  ;;  %v3497_v56 = vld [vmem:[%s4907_s1 + $0x810] ss:$8 sps:$4 sm:$0xff]   ;;  %v3505_v57 = vld [vmem:[%s4907_s1 + $0x824] ss:$8 sps:$4 sm:$0xff]  }
  0x95   :  { %2442 = vmatprep.subr.bf16.mxu0 %v3427_v58  ;;  %v3500_v58 = vld [vmem:[%s4907_s1 + $0x320] ss:$8 sps:$4 sm:$0xff]  }
  0x97   :  { %2238 = vmatpush1.bf16.msra.mxu1 %v3422_v59  ;;  %v3503_v59 = vld [vmem:[%s4907_s1 + $0x820] ss:$8 sps:$4 sm:$0xff]  }
  0x98   :  { %2443 = vmatpush1.bf16.msra.mxu0 %v3425_v60  ;;  %2239 = vmatprep.subr.bf16.mxu1 %v3430_v61  ;;  %v3508_v60 = vld [vmem:[%s4907_s1 + $0x334] ss:$8 sps:$4 sm:$0xff]  }
  0x99   :  { %2444 = vmatprep.subr.bf16.mxu0 %v3433_v62  ;;  %v3511_v61 = vld [vmem:[%s4907_s1 + $0x834] ss:$8 sps:$4 sm:$0xff]   ;;  %v3506_v62 = vld [vmem:[%s4907_s1 + $0x330] ss:$8 sps:$4 sm:$0xff]  }
  0x9b   :  { %2240 = vmatpush1.bf16.msra.mxu1 %v3428_v63  ;;  %v3509_v63 = vld [vmem:[%s4907_s1 + $0x830] ss:$8 sps:$4 sm:$0xff]  }
  0x9c   :  { %2445 = vmatpush1.bf16.msra.mxu0 %v3431_v0  ;;  %2241 = vmatprep.subr.bf16.mxu1 %v3436_v1  ;;  %v3514_v0 = vld [vmem:[%s4907_s1 + $0x344] ss:$8 sps:$4 sm:$0xff]  }
  0x9d   :  { %2446 = vmatprep.subr.bf16.mxu0 %v3439_v2  ;;  %v3517_v1 = vld [vmem:[%s4907_s1 + $0x844] ss:$8 sps:$4 sm:$0xff]   ;;  %v3512_v2 = vld [vmem:[%s4907_s1 + $0x340] ss:$8 sps:$4 sm:$0xff]  }
  0x9f   :  { %2242 = vmatpush1.bf16.msra.mxu1 %v3434_v4  ;;  %v3515_v4 = vld [vmem:[%s4907_s1 + $0x840] ss:$8 sps:$4 sm:$0xff]  }
  0xa0   :  { %2447 = vmatpush1.bf16.msra.mxu0 %v3437_v5  ;;  %2243 = vmatprep.subr.bf16.mxu1 %v3442_v6  ;;  %v3520_v5 = vld [vmem:[%s4907_s1 + $0x354] ss:$8 sps:$4 sm:$0xff]  }
  0xa1   :  { %2448 = vmatprep.subr.bf16.mxu0 %v3445_v7  ;;  %v3523_v6 = vld [vmem:[%s4907_s1 + $0x854] ss:$8 sps:$4 sm:$0xff]   ;;  %v3518_v7 = vld [vmem:[%s4907_s1 + $0x350] ss:$8 sps:$4 sm:$0xff]  }
  0xa3   :  { %2244 = vmatpush1.bf16.msra.mxu1 %v3440_v8  ;;  %v3521_v8 = vld [vmem:[%s4907_s1 + $0x850] ss:$8 sps:$4 sm:$0xff]  }
  0xa4   :  { %2449 = vmatpush1.bf16.msra.mxu0 %v3443_v9  ;;  %2245 = vmatprep.subr.bf16.mxu1 %v3448_v10  ;;  %v3526_v9 = vld [vmem:[%s4907_s1 + $0x364] ss:$8 sps:$4 sm:$0xff]  }
  0xa5   :  { %2450 = vmatprep.subr.bf16.mxu0 %v3451_v11  ;;  %v3529_v10 = vld [vmem:[%s4907_s1 + $0x864] ss:$8 sps:$4 sm:$0xff]   ;;  %v3524_v11 = vld [vmem:[%s4907_s1 + $0x360] ss:$8 sps:$4 sm:$0xff]  }
  0xa7   :  { %2246 = vmatpush1.bf16.msra.mxu1 %v3446_v12  ;;  %v3527_v12 = vld [vmem:[%s4907_s1 + $0x860] ss:$8 sps:$4 sm:$0xff]  }
  0xa8   :  { %2451 = vmatpush1.bf16.msra.mxu0 %v3449_v13  ;;  %2247 = vmatprep.subr.bf16.mxu1 %v3454_v16  ;;  %v3532_v13 = vld [vmem:[%s4907_s1 + $0x374] ss:$8 sps:$4 sm:$0xff]  }
  0xa9   :  { %2452 = vmatprep.subr.bf16.mxu0 %v3457_v17  ;;  %v3535_v16 = vld [vmem:[%s4907_s1 + $0x874] ss:$8 sps:$4 sm:$0xff]   ;;  %v3530_v17 = vld [vmem:[%s4907_s1 + $0x370] ss:$8 sps:$4 sm:$0xff]  }
  0xab   :  { %2248 = vmatpush1.bf16.msra.mxu1 %v3452_v18  ;;  %v3533_v18 = vld [vmem:[%s4907_s1 + $0x870] ss:$8 sps:$4 sm:$0xff]  }
  0xac   :  { %2453 = vmatpush1.bf16.msra.mxu0 %v3455_v19  ;;  %2249 = vmatprep.subr.bf16.mxu1 %v3460_v20  ;;  %v3538_v19 = vld [vmem:[%s4907_s1 + $0x384] ss:$8 sps:$4 sm:$0xff]  }
  0xad   :  { %2454 = vmatprep.subr.bf16.mxu0 %v3463_v22  ;;  %v3541_v20 = vld [vmem:[%s4907_s1 + $0x884] ss:$8 sps:$4 sm:$0xff]   ;;  %v3536_v22 = vld [vmem:[%s4907_s1 + $0x380] ss:$8 sps:$4 sm:$0xff]  }
  0xaf   :  { %2250 = vmatpush1.bf16.msra.mxu1 %v3458_v23  ;;  %v3539_v23 = vld [vmem:[%s4907_s1 + $0x880] ss:$8 sps:$4 sm:$0xff]  }
  0xb0   :  { %2455 = vmatpush1.bf16.msra.mxu0 %v3461_v24  ;;  %2251 = vmatprep.subr.bf16.mxu1 %v3466_v25  ;;  %v3544_v24 = vld [vmem:[%s4907_s1 + $0x394] ss:$8 sps:$4 sm:$0xff]  }
  0xb1   :  { %2456 = vmatprep.subr.bf16.mxu0 %v3469_v26  ;;  %v3547_v25 = vld [vmem:[%s4907_s1 + $0x894] ss:$8 sps:$4 sm:$0xff]   ;;  %v3542_v26 = vld [vmem:[%s4907_s1 + $0x390] ss:$8 sps:$4 sm:$0xff]  }
  0xb3   :  { %2252 = vmatpush1.bf16.msra.mxu1 %v3464_v27  ;;  %v3545_v27 = vld [vmem:[%s4907_s1 + $0x890] ss:$8 sps:$4 sm:$0xff]  }
  0xb4   :  { %2457 = vmatpush1.bf16.msra.mxu0 %v3467_v52  ;;  %2253 = vmatprep.subr.bf16.mxu1 %v3472_v30  ;;  %v3550_v52 = vld [vmem:[%s4907_s1 + $0x3a4] ss:$8 sps:$4 sm:$0xff]  }
  0xb5   :  { %2458 = vmatprep.subr.bf16.mxu0 %v3475_v31  ;;  %v3553_v30 = vld [vmem:[%s4907_s1 + $0x8a4] ss:$8 sps:$4 sm:$0xff]  }
  0xb7   :  { %2254 = vmatpush1.bf16.msra.mxu1 %v3470_v32 }
  0xb8   :  { %2459 = vmatpush1.bf16.msra.mxu0 %v3473_v33  ;;  %2255 = vmatprep.subr.bf16.mxu1 %v3478_v34 }
  0xb9   :  { %2460 = vmatprep.subr.bf16.mxu0 %v3481_v35 }
  0xbb   :  { %2256 = vmatpush1.bf16.msra.mxu1 %v3476_v37 }
  0xbc   :  { %2461 = vmatpush1.bf16.msra.mxu0 %v3479_v21  ;;  %2257 = vmatprep.subr.bf16.mxu1 %v3484_v14 }
  0xbd   :  { %2462 = vmatprep.subr.bf16.mxu0 %v3487_v40 }
  0xbf   :  { %2258 = vmatpush1.bf16.msra.mxu1 %v3482_v42 }
  0xc0   :  { %2463 = vmatpush1.bf16.msra.mxu0 %v3485_v43  ;;  %2268 = vmatprep.subr.bf16.mxu1 %v3490_v28 }
  0xc1   :  { %2473 = vmatprep.subr.bf16.mxu0 %v3493_v44 }
  0xc2   :  { %2260 = vmatmul.mubr.bf16.vlgmr.msra.gmra.mrb[0].mxu1 %v4423_v48 }
  0xc3   :  { %2465 = vmatmul.mubr.bf16.vlgmr.msra.gmra.mrb[0].mxu0 %v459_v49  ;;  %2269 = vmatpush1.bf16.msra.mxu1 %v3488_v47 }
  0xc4   :  { %2474 = vmatpush1.bf16.msra.mxu0 %v3491_v50  ;;  %2270 = vmatprep.subr.bf16.mxu1 %v3496_v53 }
  0xc5   :  { %2475 = vmatprep.subr.bf16.mxu0 %v3499_v29  ;;  %2300 = vmatprep.mubr.bf16.mxu1 %v412_v54 }
  0xc6   :  { %2505 = vmatprep.mubr.bf16.mxu0 %v4439_v36 }
  0xc7   :  { %2271 = vmatpush1.bf16.msra.mxu1 %v3494_v55 }
  0xc8   :  { %2476 = vmatpush1.bf16.msra.mxu0 %v3497_v56  ;;  %2272 = vmatprep.subr.bf16.mxu1 %v3502_v39 }
  0xc9   :  { %2477 = vmatprep.subr.bf16.mxu0 %v3505_v57 }
  0xcb   :  { %2273 = vmatpush1.bf16.msra.mxu1 %v3500_v58 }
  0xcc   :  { %2478 = vmatpush1.bf16.msra.mxu0 %v3503_v59  ;;  %2274 = vmatprep.subr.bf16.mxu1 %v3508_v60 }
  0xcd   :  { %2479 = vmatprep.subr.bf16.mxu0 %v3511_v61 }
  0xcf   :  { %2275 = vmatpush1.bf16.msra.mxu1 %v3506_v62 }
  0xd0   :  { %2480 = vmatpush1.bf16.msra.mxu0 %v3509_v63  ;;  %2276 = vmatprep.subr.bf16.mxu1 %v3514_v0 }
  0xd1   :  { %2481 = vmatprep.subr.bf16.mxu0 %v3517_v1 }
  0xd3   :  { %2277 = vmatpush1.bf16.msra.mxu1 %v3512_v2 }
  0xd4   :  { %2482 = vmatpush1.bf16.msra.mxu0 %v3515_v4  ;;  %2278 = vmatprep.subr.bf16.mxu1 %v3520_v5 }
  0xd5   :  { %2483 = vmatprep.subr.bf16.mxu0 %v3523_v6 }
  0xd7   :  { %2279 = vmatpush1.bf16.msra.mxu1 %v3518_v7 }
  0xd8   :  { %2484 = vmatpush1.bf16.msra.mxu0 %v3521_v8  ;;  %2280 = vmatprep.subr.bf16.mxu1 %v3526_v9 }
  0xd9   :  { %2485 = vmatprep.subr.bf16.mxu0 %v3529_v10 }
  0xdb   :  { %2281 = vmatpush1.bf16.msra.mxu1 %v3524_v11 }
  0xdc   :  { %2486 = vmatpush1.bf16.msra.mxu0 %v3527_v12  ;;  %2282 = vmatprep.subr.bf16.mxu1 %v3532_v13 }
  0xdd   :  { %2487 = vmatprep.subr.bf16.mxu0 %v3535_v16 }
  0xdf   :  { %2283 = vmatpush1.bf16.msra.mxu1 %v3530_v17 }
  0xe0   :  { %2488 = vmatpush1.bf16.msra.mxu0 %v3533_v18  ;;  %2284 = vmatprep.subr.bf16.mxu1 %v3538_v19 }
  0xe1   :  { %2489 = vmatprep.subr.bf16.mxu0 %v3541_v20 }
  0xe3   :  { %2285 = vmatpush1.bf16.msra.mxu1 %v3536_v22 }
  0xe4   :  { %2490 = vmatpush1.bf16.msra.mxu0 %v3539_v23  ;;  %2286 = vmatprep.subr.bf16.mxu1 %v3544_v24 }
  0xe5   :  { %2491 = vmatprep.subr.bf16.mxu0 %v3547_v25 }
  0xe6   :  { %10 = vsyncpa [#allocation3], 0  ;;  %v3548_v31 = vld [vmem:[%s4907_s1 + $0x3a0] ss:$8 sps:$4 sm:$0xff]   ;;  %v3556_v33 = vld [vmem:[%s4907_s1 + $0x3b4] ss:$8 sps:$4 sm:$0xff]   ;;  %v410_v58 = vcombine.high %v4423_v48, %v4423_v48  ;;  %v4627_v59 = vrot.slane %v4402_v41, %v3901_v51  ;;  %v500_v62 = vcombine.high %v4439_v36, %v4439_v36 }
  0xe7   :  { %2287 = vmatpush1.bf16.msra.mxu1 %v3542_v26  ;;  %v3551_v32 = vld [vmem:[%s4907_s1 + $0x8a0] ss:$8 sps:$4 sm:$0xff]   ;;  %v3559_v34 = vld [vmem:[%s4907_s1 + $0x8b4] ss:$8 sps:$4 sm:$0xff]   ;;  %v3554_v35 = vld [vmem:[%s4907_s1 + $0x3b0] ss:$8 sps:$4 sm:$0xff]  }
  0xe8   :  { %2492 = vmatpush1.bf16.msra.mxu0 %v3545_v27  ;;  %2288 = vmatprep.subr.bf16.mxu1 %v3550_v52  ;;  %v3557_v37 = vld [vmem:[%s4907_s1 + $0x8b0] ss:$8 sps:$4 sm:$0xff]   ;;  %v3562_v21 = vld [vmem:[%s4907_s1 + $0x3c4] ss:$8 sps:$4 sm:$0xff]   ;;  %v3560_v40 = vld [vmem:[%s4907_s1 + $0x3c0] ss:$8 sps:$4 sm:$0xff]  }
  0xe9   :  { %2493 = vmatprep.subr.bf16.mxu0 %v3553_v30  ;;  %v3565_v14 = vld [vmem:[%s4907_s1 + $0x8c4] ss:$8 sps:$4 sm:$0xff]   ;;  %v3563_v42 = vld [vmem:[%s4907_s1 + $0x8c0] ss:$8 sps:$4 sm:$0xff]   ;;  %v3568_v43 = vld [vmem:[%s4907_s1 + $0x3d4] ss:$8 sps:$4 sm:$0xff]  }
  0xea   :  { %v3571_v28 = vld [vmem:[%s4907_s1 + $0x8d4] ss:$8 sps:$4 sm:$0xff]   ;;  %v3566_v44 = vld [vmem:[%s4907_s1 + $0x3d0] ss:$8 sps:$4 sm:$0xff]   ;;  %v3574_v47 = vld [vmem:[%s4907_s1 + $0x3e4] ss:$8 sps:$4 sm:$0xff]  }
  0xeb   :  { %2289 = vmatpush1.bf16.msra.mxu1 %v3548_v31  ;;  %v3569_v46 = vld [vmem:[%s4907_s1 + $0x8d0] ss:$8 sps:$4 sm:$0xff]   ;;  %v3577_v49 = vld [vmem:[%s4907_s1 + $0x8e4] ss:$8 sps:$4 sm:$0xff]   ;;  %v3572_v50 = vld [vmem:[%s4907_s1 + $0x3e0] ss:$8 sps:$4 sm:$0xff]  }
  0xec   :  { %2494 = vmatpush1.bf16.msra.mxu0 %v3551_v32  ;;  %2290 = vmatprep.subr.bf16.mxu1 %v3556_v33  ;;  %v3575_v53 = vld [vmem:[%s4907_s1 + $0x8e0] ss:$8 sps:$4 sm:$0xff]   ;;  %v3580_v29 = vld [vmem:[%s4907_s1 + $0x3f4] ss:$8 sps:$4 sm:$0xff]   ;;  %v3578_v55 = vld [vmem:[%s4907_s1 + $0x3f0] ss:$8 sps:$4 sm:$0xff]  }
  0xed   :  { %2495 = vmatprep.subr.bf16.mxu0 %v3559_v34  ;;  %v3583_v54 = vld [vmem:[%s4907_s1 + $0x8f4] ss:$8 sps:$4 sm:$0xff]   ;;  %v3581_v56 = vld [vmem:[%s4907_s1 + $0x8f0] ss:$8 sps:$4 sm:$0xff]   ;;  %v3586_v39 = vld [vmem:[%s4907_s1 + $0x404] ss:$8 sps:$4 sm:$0xff]  }
  0xee   :  { %v3590_v57 = vld [vmem:[%s4907_s1 + $0x904] ss:$8 sps:$4 sm:$0xff]   ;;  %v3584_v60 = vld [vmem:[%s4907_s1 + $0x400] ss:$8 sps:$4 sm:$0xff]   ;;  %v3593_v48 = vld [vmem:[%s4907_s1 + $0x414] ss:$8 sps:$4 sm:$0xff]  }
  0xef   :  { %2291 = vmatpush1.bf16.msra.mxu1 %v3554_v35  ;;  %v3588_v61 = vld [vmem:[%s4907_s1 + $0x900] ss:$8 sps:$4 sm:$0xff]   ;;  %v3596_v41 = vld [vmem:[%s4907_s1 + $0x914] ss:$8 sps:$4 sm:$0xff]   ;;  %v3591_v63 = vld [vmem:[%s4907_s1 + $0x410] ss:$8 sps:$4 sm:$0xff]  }
  0xf0   :  { %2496 = vmatpush1.bf16.msra.mxu0 %v3557_v37  ;;  %2292 = vmatprep.subr.bf16.mxu1 %v3562_v21  ;;  %v3594_v0 = vld [vmem:[%s4907_s1 + $0x910] ss:$8 sps:$4 sm:$0xff]   ;;  %v3599_v1 = vld [vmem:[%s4907_s1 + $0x424] ss:$8 sps:$4 sm:$0xff]   ;;  %v3597_v2 = vld [vmem:[%s4907_s1 + $0x420] ss:$8 sps:$4 sm:$0xff]  }
  0xf1   :  { %2497 = vmatprep.subr.bf16.mxu0 %v3565_v14  ;;  %v3602_v36 = vld [vmem:[%s4907_s1 + $0x924] ss:$8 sps:$4 sm:$0xff]   ;;  %v3600_v4 = vld [vmem:[%s4907_s1 + $0x920] ss:$8 sps:$4 sm:$0xff]   ;;  %v3605_v5 = vld [vmem:[%s4907_s1 + $0x434] ss:$8 sps:$4 sm:$0xff]  }
  0xf2   :  { %v3603_v6 = vld [vmem:[%s4907_s1 + $0x430] ss:$8 sps:$4 sm:$0xff]   ;;  %v3611_v8 = vld [vmem:[%s4907_s1 + $0x444] ss:$8 sps:$4 sm:$0xff]   ;;  %v3609_v10 = vld [vmem:[%s4907_s1 + $0x440] ss:$8 sps:$4 sm:$0xff]  }
  0xf3   :  { %2293 = vmatpush1.bf16.msra.mxu1 %v3560_v40  ;;  %v3606_v7 = vld [vmem:[%s4907_s1 + $0x930] ss:$8 sps:$4 sm:$0xff]   ;;  %v3614_v9 = vld [vmem:[%s4907_s1 + $0x944] ss:$8 sps:$4 sm:$0xff]   ;;  %v3612_v11 = vld [vmem:[%s4907_s1 + $0x940] ss:$8 sps:$4 sm:$0xff]  }
  0xf4   :  { %2498 = vmatpush1.bf16.msra.mxu0 %v3563_v42  ;;  %2294 = vmatprep.subr.bf16.mxu1 %v3568_v43  ;;  %v3617_v12 = vld [vmem:[%s4907_s1 + $0x454] ss:$8 sps:$4 sm:$0xff]   ;;  %v3615_v16 = vld [vmem:[%s4907_s1 + $0x450] ss:$8 sps:$4 sm:$0xff]   ;;  %v3623_v18 = vld [vmem:[%s4907_s1 + $0x464] ss:$8 sps:$4 sm:$0xff]  }
  0xf5   :  { %2499 = vmatprep.subr.bf16.mxu0 %v3571_v28  ;;  %v3620_v13 = vld [vmem:[%s4907_s1 + $0x954] ss:$8 sps:$4 sm:$0xff]   ;;  %v3618_v17 = vld [vmem:[%s4907_s1 + $0x950] ss:$8 sps:$4 sm:$0xff]   ;;  %v3626_v19 = vld [vmem:[%s4907_s1 + $0x964] ss:$8 sps:$4 sm:$0xff]  }
  0xf6   :  { %v3621_v20 = vld [vmem:[%s4907_s1 + $0x460] ss:$8 sps:$4 sm:$0xff]   ;;  %v3629_v23 = vld [vmem:[%s4907_s1 + $0x474] ss:$8 sps:$4 sm:$0xff]   ;;  %v3627_v25 = vld [vmem:[%s4907_s1 + $0x470] ss:$8 sps:$4 sm:$0xff]  }
  0xf7   :  { %2295 = vmatpush1.bf16.msra.mxu1 %v3566_v44  ;;  %v3624_v22 = vld [vmem:[%s4907_s1 + $0x960] ss:$8 sps:$4 sm:$0xff]   ;;  %v3632_v24 = vld [vmem:[%s4907_s1 + $0x974] ss:$8 sps:$4 sm:$0xff]   ;;  %v3630_v26 = vld [vmem:[%s4907_s1 + $0x970] ss:$8 sps:$4 sm:$0xff]  }
  0xf8   :  { %2500 = vmatpush1.bf16.msra.mxu0 %v3569_v46  ;;  %2296 = vmatprep.subr.bf16.mxu1 %v3574_v47  ;;  %v3635_v27 = vld [vmem:[%s4907_s1 + $0x484] ss:$8 sps:$4 sm:$0xff]   ;;  %v3633_v30 = vld [vmem:[%s4907_s1 + $0x480] ss:$8 sps:$4 sm:$0xff]   ;;  %v3641_v32 = vld [vmem:[%s4907_s1 + $0x494] ss:$8 sps:$4 sm:$0xff]  }
  0xf9   :  { %2501 = vmatprep.subr.bf16.mxu0 %v3577_v49  ;;  %v3638_v52 = vld [vmem:[%s4907_s1 + $0x984] ss:$8 sps:$4 sm:$0xff]   ;;  %v3636_v31 = vld [vmem:[%s4907_s1 + $0x980] ss:$8 sps:$4 sm:$0xff]   ;;  %v3644_v33 = vld [vmem:[%s4907_s1 + $0x994] ss:$8 sps:$4 sm:$0xff]  }
  0xfa   :  { %v3639_v34 = vld [vmem:[%s4907_s1 + $0x490] ss:$8 sps:$4 sm:$0xff]   ;;  %v3647_v37 = vld [vmem:[%s4907_s1 + $0x4a4] ss:$8 sps:$4 sm:$0xff]   ;;  %v3645_v14 = vld [vmem:[%s4907_s1 + $0x4a0] ss:$8 sps:$4 sm:$0xff]  }
  0xfb   :  { %2297 = vmatpush1.bf16.msra.mxu1 %v3572_v50  ;;  %v3642_v35 = vld [vmem:[%s4907_s1 + $0x990] ss:$8 sps:$4 sm:$0xff]   ;;  %v3650_v21 = vld [vmem:[%s4907_s1 + $0x9a4] ss:$8 sps:$4 sm:$0xff]   ;;  %v3648_v40 = vld [vmem:[%s4907_s1 + $0x9a0] ss:$8 sps:$4 sm:$0xff]  }
  0xfc   :  { %2502 = vmatpush1.bf16.msra.mxu0 %v3575_v53  ;;  %2298 = vmatprep.subr.bf16.mxu1 %v3580_v29  ;;  %v3653_v42 = vld [vmem:[%s4907_s1 + $0x4b4] ss:$8 sps:$4 sm:$0xff]   ;;  %v3651_v28 = vld [vmem:[%s4907_s1 + $0x4b0] ss:$8 sps:$4 sm:$0xff]   ;;  %v3659_v46 = vld [vmem:[%s4907_s1 + $0x4c4] ss:$8 sps:$4 sm:$0xff]  }
  0xfd   :  { %2503 = vmatprep.subr.bf16.mxu0 %v3583_v54  ;;  %v3656_v43 = vld [vmem:[%s4907_s1 + $0x9b4] ss:$8 sps:$4 sm:$0xff]   ;;  %v3654_v44 = vld [vmem:[%s4907_s1 + $0x9b0] ss:$8 sps:$4 sm:$0xff]   ;;  %v3662_v47 = vld [vmem:[%s4907_s1 + $0x9c4] ss:$8 sps:$4 sm:$0xff]  }
  0xfe   :  { %v3657_v49 = vld [vmem:[%s4907_s1 + $0x4c0] ss:$8 sps:$4 sm:$0xff]   ;;  %v3665_v53 = vld [vmem:[%s4907_s1 + $0x4d4] ss:$8 sps:$4 sm:$0xff]   ;;  %v3663_v54 = vld [vmem:[%s4907_s1 + $0x4d0] ss:$8 sps:$4 sm:$0xff]  }
  0xff   :  { %2299 = vmatpush1.bf16.msra.mxu1 %v3578_v55  ;;  %v3660_v50 = vld [vmem:[%s4907_s1 + $0x9c0] ss:$8 sps:$4 sm:$0xff]   ;;  %v3668_v29 = vld [vmem:[%s4907_s1 + $0x9d4] ss:$8 sps:$4 sm:$0xff]   ;;  %v3666_v55 = vld [vmem:[%s4907_s1 + $0x9d0] ss:$8 sps:$4 sm:$0xff]  }
 0x100   :  { %2504 = vmatpush1.bf16.msra.mxu0 %v3581_v56  ;;  %2309 = vmatprep.subr.bf16.mxu1 %v3586_v39  ;;  %v3671_v56 = vld [vmem:[%s4907_s1 + $0x4e4] ss:$8 sps:$4 sm:$0xff]   ;;  %vm2141_vm0 = vcmask 261120   ;;  %s3729_s18 = smov [#allocation2]   ;;  %vm2775_vm1 = vcmask 41984  }
 0x101   :  { %2514 = vmatprep.subr.bf16.mxu0 %v3590_v57  ;;  %v3674_v39 = vld [vmem:[%s4907_s1 + $0x9e4] ss:$8 sps:$4 sm:$0xff]   ;;  %v3669_v57 = vld [vmem:[%s4907_s1 + $0x4e0] ss:$8 sps:$4 sm:$0xff]   ;;  %s2783_s19 = sshll.u32 %s3729_s18, 4  ;;  %s2784_s19 = int_to_ptr.vmem [resolvable:$true] %s2783_s19 }
 0x102   :  { %2301 = vmatmul.mubr.bf16.vlgmr.msra.gmra.mrb[0].mxu1 %v410_v58  ;;  %v3672_v58 = vld [vmem:[%s4907_s1 + $0x9e0] ss:$8 sps:$4 sm:$0xff]   ;;  %s3703_s20 = scalar_lea.vmem %s2784_s19, 32  ;;  %p3708_p1 = scmp.lt.s32.totalorder %s2784_s19, %s2784_s19 }
 0x103   :  { %2506 = vmatmul.mubr.bf16.vlgmr.msra.gmra.mrb[0].mxu0 %v4627_v59  ;;  %2310 = vmatpush1.bf16.msra.mxu1 %v3584_v60  ;;  %v3677_v60 = vld [vmem:[%s4907_s1 + $0x4f4] ss:$8 sps:$4 sm:$0xff]   ;;  %p3704_p0 = scmp.ne.s32.totalorder %s2784_s19, %s3703_s20  ;;  %p3709_p2 = scmp.lt.s32.totalorder %s3703_s20, %s3703_s20 }
 0x104   :  { %2515 = vmatpush1.bf16.msra.mxu0 %v3588_v61  ;;  %2311 = vmatprep.subr.bf16.mxu1 %v3593_v48  ;;  %v3680_v61 = vld [vmem:[%s4907_s1 + $0x9f4] ss:$8 sps:$4 sm:$0xff]   ;;  %v3675_v48 = vld [vmem:[%s4907_s1 + $0x4f0] ss:$8 sps:$4 sm:$0xff]  }
 0x105   :  { %2516 = vmatprep.subr.bf16.mxu0 %v3596_v41  ;;  %2341 = vmatprep.mubr.bf16.mxu1 %v3942_v3  ;;  %v3608_v3 = vld [vmem:[%s4907_s1 + $0x934] ss:$8 sps:$4 sm:$0xff]   ;;  %v3678_v41 = vld [vmem:[%s4907_s1 + $0x9f0] ss:$8 sps:$4 sm:$0xff]   ;;  %p3710_p3 = por %p3709_p2, %p3708_p1 }
 0x106   :  { %2546 = vmatprep.mubr.bf16.mxu0 %v500_v62  ;;  %v3683_v62 = vld [vmem:[%s4907_s1 + $0xa04] ss:$8 sps:$4 sm:$0xff]  }
 0x107   :  { %2312 = vmatpush1.bf16.msra.mxu1 %v3591_v63  ;;  %v3687_v63 = vld [vmem:[%s4909_s3 + $0x40] sm:$0xff]   ;;  %p3711_p4 = pnand %p3710_p3, %p3704_p0 }
 0x108   :  { %2517 = vmatpush1.bf16.msra.mxu0 %v3594_v0  ;;  %2313 = vmatprep.subr.bf16.mxu1 %v3599_v1  ;;  %v499_v0 = vcombine.high %v4627_v59, %v4627_v59  ;;  %v3681_v1 = vld [vmem:[%s4907_s1 + $0xa00] ss:$8 sps:$4 sm:$0xff]  }
 0x109   :  { %2518 = vmatprep.subr.bf16.mxu0 %v3602_v36  ;;  %v3686_v36 = vld [vmem:[%s4907_s1 + $0xa14] ss:$8 sps:$4 sm:$0xff]   ;;  %v3689_v59 = vld [vmem:[%s4909_s3 + $0x48] sm:$0xff]  }
 0x10b   :  { %2314 = vmatpush1.bf16.msra.mxu1 %v3597_v2  ;;  %v3688_v2 = vld [vmem:[%s4909_s3] sm:$0xff]  }
 0x10c   :  { %2519 = vmatpush1.bf16.msra.mxu0 %v3600_v4  ;;  %2315 = vmatprep.subr.bf16.mxu1 %v3605_v5  ;;  %v462_v4 = vcombine.high %v4389_v38, %v4389_v38  ;;  %v3684_v5 = vld [vmem:[%s4907_s1 + $0xa10] ss:$8 sps:$4 sm:$0xff]  }
 0x10d   :  { %2520 = vmatprep.subr.bf16.mxu0 %v3608_v3  ;;  %v3728_v3 = vmov 0   ;;  %v3691_v38 = vld [vmem:[%s4909_s3 + $0x50] sm:$0xff]  }
 0x10f   :  { %2316 = vmatpush1.bf16.msra.mxu1 %v3603_v6  ;;  %v3690_v6 = vld [vmem:[%s4909_s3 + $0x8] sm:$0xff]  }
 0x110   :  { %2521 = vmatpush1.bf16.msra.mxu0 %v3606_v7  ;;  %2317 = vmatprep.subr.bf16.mxu1 %v3611_v8  ;;  %v3692_v7 = vld [vmem:[%s4909_s3 + $0x10] sm:$0xff]  }
 0x111   :  { %2522 = vmatprep.subr.bf16.mxu0 %v3614_v9  ;;  %v3693_v9 = vld [vmem:[%s4909_s3 + $0x58] sm:$0xff]  }
 0x113   :  { %2318 = vmatpush1.bf16.msra.mxu1 %v3609_v10  ;;  %v3694_v10 = vld [vmem:[%s4909_s3 + $0x18] sm:$0xff]  }
 0x114   :  { %2523 = vmatpush1.bf16.msra.mxu0 %v3612_v11  ;;  %2319 = vmatprep.subr.bf16.mxu1 %v3617_v12  ;;  %v3695_v11 = vld [vmem:[%s4909_s3 + $0x60] sm:$0xff]   ;;  %v3697_v12 = vld [vmem:[%s4909_s3 + $0x68] sm:$0xff]  }
 0x115   :  { %2524 = vmatprep.subr.bf16.mxu0 %v3620_v13  ;;  %v3698_v13 = vld [vmem:[%s4909_s3 + $0x28] sm:$0xff]  }
 0x117   :  { %2320 = vmatpush1.bf16.msra.mxu1 %v3615_v16  ;;  %v3699_v16 = vld [vmem:[%s4909_s3 + $0x70] sm:$0xff]  }
 0x118   :  { %2525 = vmatpush1.bf16.msra.mxu0 %v3618_v17  ;;  %2321 = vmatprep.subr.bf16.mxu1 %v3623_v18  ;;  %v3700_v17 = vld [vmem:[%s4909_s3 + $0x30] sm:$0xff]   ;;  %v3701_v18 = vld [vmem:[%s4909_s3 + $0x78] sm:$0xff]  }
 0x119   :  { %2526 = vmatprep.subr.bf16.mxu0 %v3626_v19  ;;  %v3702_v19 = vld [vmem:[%s4909_s3 + $0x38] sm:$0xff]  }
 0x11b   :  { %2322 = vmatpush1.bf16.msra.mxu1 %v3621_v20 }
 0x11c   :  { %2527 = vmatpush1.bf16.msra.mxu0 %v3624_v22  ;;  %2323 = vmatprep.subr.bf16.mxu1 %v3629_v23 }
 0x11d   :  { %2528 = vmatprep.subr.bf16.mxu0 %v3632_v24  ;;  %v353_v24 = vsub.s32 0, %v3886_v45 }
 0x11f   :  { %2324 = vmatpush1.bf16.msra.mxu1 %v3627_v25 }
 0x120   :  { %2529 = vmatpush1.bf16.msra.mxu0 %v3630_v26  ;;  %2325 = vmatprep.subr.bf16.mxu1 %v3635_v27  ;;  %v349_v26 = vld [vmem:[%s4908_s2] sm:$0x3]  ;;  %v357_v27 = vsub.s32 1, %v3886_v45 }
 0x121   :  { %2530 = vmatprep.subr.bf16.mxu0 %v3638_v52  ;;  %v354_v52 = vrot.slane %v349_v26, %v353_v24  ;;  %v3116_v45 = vld [vmem:[%s4910_s4] ss:$0 sm:$0xff] }
 0x123   :  { %2326 = vmatpush1.bf16.msra.mxu1 %v3633_v30  ;;  %v358_v30 = vrot.slane %v349_v26, %v357_v27 }
 0x124   :  { %2531 = vmatpush1.bf16.msra.mxu0 %v3636_v31  ;;  %2327 = vmatprep.subr.bf16.mxu1 %v3641_v32 }
 0x125   :  { %2532 = vmatprep.subr.bf16.mxu0 %v3644_v33 }
 0x127   :  { %2328 = vmatpush1.bf16.msra.mxu1 %v3639_v34 }
 0x128   :  { %2533 = vmatpush1.bf16.msra.mxu0 %v3642_v35  ;;  %2329 = vmatprep.subr.bf16.mxu1 %v3647_v37 }
 0x129   :  { %2534 = vmatprep.subr.bf16.mxu0 %v3650_v21 }
 0x12b   :  { %2330 = vmatpush1.bf16.msra.mxu1 %v3645_v14 }
 0x12c   :  { %2535 = vmatpush1.bf16.msra.mxu0 %v3648_v40  ;;  %2331 = vmatprep.subr.bf16.mxu1 %v3653_v42 }
 0x12d   :  { %2536 = vmatprep.subr.bf16.mxu0 %v3656_v43 }
 0x12f   :  { %2332 = vmatpush1.bf16.msra.mxu1 %v3651_v28 }
 0x130   :  { %2537 = vmatpush1.bf16.msra.mxu0 %v3654_v44  ;;  %2333 = vmatprep.subr.bf16.mxu1 %v3659_v46 }
 0x131   :  { %2538 = vmatprep.subr.bf16.mxu0 %v3662_v47 }
 0x133   :  { %2334 = vmatpush1.bf16.msra.mxu1 %v3657_v49 }
 0x134   :  { %2539 = vmatpush1.bf16.msra.mxu0 %v3660_v50  ;;  %2335 = vmatprep.subr.bf16.mxu1 %v3665_v53 }
 0x135   :  { %2540 = vmatprep.subr.bf16.mxu0 %v3668_v29 }
 0x137   :  { %2336 = vmatpush1.bf16.msra.mxu1 %v3663_v54 }
 0x138   :  { %2541 = vmatpush1.bf16.msra.mxu0 %v3666_v55  ;;  %2337 = vmatprep.subr.bf16.mxu1 %v3671_v56 }
 0x139   :  { %2542 = vmatprep.subr.bf16.mxu0 %v3674_v39 }
 0x13b   :  { %2338 = vmatpush1.bf16.msra.mxu1 %v3669_v57 }
 0x13c   :  { %2543 = vmatpush1.bf16.msra.mxu0 %v3672_v58  ;;  %2339 = vmatprep.subr.bf16.mxu1 %v3677_v60 }
 0x13d   :  { %2544 = vmatprep.subr.bf16.mxu0 %v3680_v61 }
 0x13f   :  { %2340 = vmatpush1.bf16.msra.mxu1 %v3675_v48 }
 0x140   :  { %2545 = vmatpush1.bf16.msra.mxu0 %v3678_v41  ;;  %3133 = vmatprep.subr.bf16.mxu1 %v3687_v63 }
 0x141   :  { %2555 = vmatprep.subr.bf16.mxu0 %v3683_v62 }
 0x142   :  { %2342 = vmatmul.mubr.bf16.vlgmr.msra.gmra.mrb[0].mxu1 %v3975_v15  ;;  %v476_v15 = vrot.slane %v462_v4, %v3901_v51 }
 0x143   :  { %2547 = vmatmul.mubr.bf16.vlgmr.msra.gmra.mrb[0].mxu0 %v499_v0  ;;  %3134 = vmatpush3.bf16.msra.mxu1 %v3688_v2 }
 0x144   :  { %2556 = vmatpush1.bf16.msra.mxu0 %v3681_v1  ;;  %2587 = vmatprep.mubr.bf16.mxu0 %v3728_v3  ;;  %v491_v8 = vrot.slane %v476_v15, %v3901_v51  ;;  %v3696_v51 = vld [vmem:[%s4909_s3 + $0x20] sm:$0xff]  }
 0x145   :  { %2557 = vmatprep.subr.bf16.mxu0 %v3686_v36  ;;  %3135 = vmatprep.subr.bf16.mxu1 %v3689_v59 }
 0x147   :  { %3136 = vmatpush3.bf16.msra.mxu1 %v3690_v6 }
 0x148   :  { %2558 = vmatpush1.bf16.msra.mxu0 %v3684_v5  ;;  %3137 = vmatprep.subr.bf16.mxu1 %v3691_v38 }
 0x14b   :  { %3138 = vmatpush3.bf16.msra.mxu1 %v3692_v7 }
 0x14c   :  { %3139 = vmatprep.subr.bf16.mxu1 %v3693_v9 }
 0x14f   :  { %3115 = vmatmul.mubr.msk.bf16.vlgmr.msra.gmra.mrb[0].mxu0 %vm2141_vm0, %v491_v8  ;;  %3140 = vmatpush3.bf16.msra.mxu1 %v3694_v10 }
 0x150   :  { %3141 = vmatprep.subr.bf16.mxu1 %v3695_v11 }
 0x153   :  { %3142 = vmatpush3.bf16.msra.mxu1 %v3696_v51 }
 0x154   :  { %3143 = vmatprep.subr.bf16.mxu1 %v3697_v12 }
 0x157   :  { %3144 = vmatpush3.bf16.msra.mxu1 %v3698_v13 }
 0x158   :  { %3145 = vmatprep.subr.bf16.mxu1 %v3699_v16 }
 0x15b   :  { %3146 = vmatpush3.bf16.msra.mxu1 %v3700_v17 }
 0x15c   :  { %3147 = vmatprep.subr.bf16.mxu1 %v3701_v18 }
 0x15f   :  { %3148 = vmatpush3.bf16.msra.mxu1 %v3702_v19 }
 0x215   :  { %v2343_v20 = vpop.f32.mrb[0].mxu1 }
 0x216   :  { %v2345_v22 = vpop.f32.mrb[1].mxu1  ;;  %v3155_v31 = vadd.f32 %v2343_v20, %v354_v52 }
 0x217   :  { %v2347_v23 = vpop.f32.mrb[2].mxu1  ;;  %v3157_v32 = vadd.f32 %v2345_v22, %v358_v30 }
 0x218   :  { %v2348_v25 = vpop.f32.mrb[3].mxu1 }
 0x222   :  { %v2589_v33 = vpop.f32.mrb[0].mxu0 }
 0x223   :  { %v3156_v34 = vadd.f32 %v3155_v31, %v2589_v33  ;;  %v2591_v35 = vpop.f32.mrb[1].mxu0 }
 0x224   :  { %v3158_v37 = vadd.f32 %v3157_v32, %v2591_v35  ;;  %v2593_v21 = vpop.f32.mrb[2].mxu0 }
 0x225   :  { %v2596_v14 = vmax.f32 %v3156_v34, 0.0  ;;  %v2594_v40 = vpop.f32.mrb[3].mxu0 }
 0x226   :  { %v2597_v42 = vmax.f32 %v3158_v37, 0.0 }
 0x227   :  { %v2598_v28 = vpack.c.bf16 %v2596_v14, %v2596_v14 }
 0x228   :  { %v2599_v43 = vpack.c.bf16 %v2597_v42, %v2597_v42 }
 0x22a   :  { %2767 = vmatprep.mubr.bf16.mxu1 %v2599_v43 }
 0x22b   :  { %2768 = vmatmul.mubr.bf16.vlgmr.msra.gmra.mrb[4].mxu1 %v2598_v28 }
 0x2fe   :  { %v3149_v44 = vpop.f32.mrb[4].mxu1 }
 0x2ff   :  { %v3150_v46 = vpop.f32.mrb[5].mxu1 }
 0x300   :  { %v3151_v47 = vadd.f32 %v3150_v46, %v3149_v44  ;;  %v3152_v49 = vpop.f32.mrb[6].mxu1 }
 0x301   :  { %v3153_v50 = vpop.f32.mrb[7].mxu1 }
 0x302   :  { %v2770_v53 = vadd.f32 %v3151_v47, %v3116_v45 }
 0x304   :  { %2776 = vst.msk [vmem:[#allocation2] sm:$0x3] %vm2775_vm1, %v2770_v53 }
 0x305   :  { %3714 = shalt.err (!%p3711_p4)
}
 0x306   :  { %s3715_s4 = scalar_lea.hbm %s4911_s5, 32 }
 0x307   :  { %p3716_p5 = scmp.ne.s32.totalorder %s4911_s5, %s3715_s4  ;;  %p3719_p6 = scmp.lt.u32.totalorder %s3715_s4, %s4911_s5 }
 0x309   :  { %p3721_p7 = pnand %p3719_p6, %p3716_p5 }
 0x30b   :  { %3724 = shalt.err (!%p3721_p7)
}
 0x30c   :  { %2786 = dma.vmem_to_hbm [thread:$0]  %s2784_s19, 32, %s4911_s5, [#allocation3]  }
 0x30d   :  { %3725 = dma.done.wait [#allocation3], 32  }
 0x30e   :  { %3726 = vsyncadd [#allocation3], 4294967264 }
 0x30f   :  { %2790 = vsyncpa [#allocation3], 1 }

</bundles_post_ra>
